<compile_context>
chip_gen: v5e
topology: v5e:2x2
jax: 0.10.0
libtpu: 0.0.40
codegen_flags: <defaults>
</compile_context>

<pallas_src>
import functools

import jax
import jax.numpy as jnp
from jax.experimental import pallas as pl
from jax.experimental.pallas import tpu as pltpu

_H_CHUNK = 128  # hidden-dim chunk inside the fused kernel (bounds vreg pressure)


def _round_up(n, m):
    return (n + m - 1) // m * m


def _pick_tiling(M):
    """Row tiling for the fused kernel: zero padding for small M, 512-row tiles for big M."""
    Mp = _round_up(M, 8)
    if Mp > 1024:
        tm = 512
        return _round_up(M, tm), tm
    if Mp >= 16 and Mp % 16 == 0:
        return Mp, Mp // 2  # grid of 2 ("parallel") with zero row padding
    return Mp, Mp


# ----------------------------------------------------------------------------
# Fused Pallas kernel: stem (1x1 conv C->256 + ReLU)  ->  projection head
#   (1x1 conv 256->512 + ReLU -> 1x1 conv 512->proj_dim), all as matmuls.
# ----------------------------------------------------------------------------
def _fused_encoder_kernel(x_ref, ws_ref, bs_ref, w1_ref, b1_ref, w2_ref, b2_ref, o_ref):
    # Stem: K <= 8 so the f32 MXU cost is negligible; keeps f32 numerics here.
    backbone = jnp.dot(x_ref[...], ws_ref[...], preferred_element_type=jnp.float32)
    backbone = jnp.maximum(backbone + bs_ref[...], 0.0)
    bb = backbone.astype(jnp.bfloat16)  # bf16 operands for the MXU, f32 accumulation

    acc = jnp.zeros(o_ref.shape, jnp.float32)
    hidden = w1_ref.shape[1]
    # Chunk the 512-wide hidden dim so the live intermediate stays <= (tm, 128)
    # instead of a (tm, 512) f32 slab that would spill the register file.
    for off in range(0, hidden, _H_CHUNK):
        c = min(_H_CHUNK, hidden - off)
        h = jnp.dot(bb, w1_ref[:, off:off + c], preferred_element_type=jnp.float32)
        h = jnp.maximum(h + b1_ref[:, off:off + c], 0.0).astype(jnp.bfloat16)
        acc = acc + jnp.dot(h, w2_ref[off:off + c, :], preferred_element_type=jnp.float32)

    # TODO(synk): proj_dim=32 (<128 lanes) makes this a masked partial store; pack
    # several row-tiles into a lane-dense slab if the workload ever grows.
    o_ref[...] = (acc + b2_ref[...]).astype(o_ref.dtype)


def _fused_encoder_apply(rows, params, proj_dim):
    """rows: (M, C) channels-last pixels of all pyramid levels -> (M, proj_dim)."""
    M, C = rows.shape
    ws = params["stem_w"]                    # (Kp, 256) f32, Kp pre-padded to 8
    Kp, fpn_c = ws.shape
    hidden = params["w1"].shape[1]
    Mp, tm = _pick_tiling(M)

    x_p = jnp.zeros((Mp, Kp), jnp.float32).at[:M, :C].set(rows)

    out = pl.pallas_call(
        _fused_encoder_kernel,
        out_shape=jax.ShapeDtypeStruct((Mp, proj_dim), jnp.float32),
        grid_spec=pltpu.PrefetchScalarGridSpec(
            num_scalar_prefetch=0,
            grid=(Mp // tm,),
            in_specs=[
                pl.BlockSpec((tm, Kp), lambda i: (i, 0)),
                pl.BlockSpec((Kp, fpn_c), lambda i: (0, 0)),
                pl.BlockSpec((1, fpn_c), lambda i: (0, 0)),
                pl.BlockSpec((fpn_c, hidden), lambda i: (0, 0)),
                pl.BlockSpec((1, hidden), lambda i: (0, 0)),
                pl.BlockSpec((hidden, proj_dim), lambda i: (0, 0)),
                pl.BlockSpec((1, proj_dim), lambda i: (0, 0)),
            ],
            out_specs=pl.BlockSpec((tm, proj_dim), lambda i: (i, 0)),
        ),
        compiler_params=pltpu.CompilerParams(dimension_semantics=("parallel",)),
    )(x_p, ws, params["stem_b"], params["w1"], params["b1"], params["w2"], params["b2"])
    return out[:M]


# ----------------------------------------------------------------------------
# Feature sampling (plain-JAX glue, vmapped over batch; mirrors the PyTorch code)
# ----------------------------------------------------------------------------
def _sample_level(feats, crop_coords, keys, grid_points, num_anchors):
    # feats: (B, h, w, D), grid_points: (h, w, 2) already scaled to image pixels.
    h, w = grid_points.shape[:2]
    D = feats.shape[-1]
    feats_flat = feats.reshape(feats.shape[0], h * w, D)
    pts_flat = grid_points.reshape(h * w, 2)

    def per_b(feat_flat_b, cc, key):
        y0, x0, hc, wc = cc[0], cc[1], cc[2], cc[3]
        center = jnp.stack([x0 + wc * 0.5, y0 + hc * 0.5])
        dists = jnp.sum((pts_flat - center[None, :]) ** 2, axis=-1)   # (h*w,)
        min_idx = jnp.argmin(dists)
        pos_feat = feat_flat_b[min_idx]

        thr = dists[min_idx] * 2.0
        valid = dists > thr
        k_score, k_fb = jax.random.split(key)
        # TODO(synk): original uses torch.randperm / torch.randint, so the exact RNG
        # stream differs; here a masked random top-k plus a with-replacement fallback
        # reproduces the same sampling semantics.
        scores = jnp.where(valid, jax.random.uniform(k_score, (h * w,)), -jnp.inf)
        _, neg_idx = jax.lax.top_k(scores, num_anchors)
        n_valid = jnp.sum(valid.astype(jnp.int32))
        # With-replacement fallback when fewer than num_anchors cells are valid.
        fb = jax.random.randint(k_fb, (num_anchors,), 0, jnp.maximum(n_valid, 1))
        neg_idx = jnp.where(jnp.arange(num_anchors) < n_valid, neg_idx, neg_idx[fb])
        neg_feats = feat_flat_b[neg_idx]
        return pos_feat, neg_feats

    return jax.vmap(per_b)(feats_flat, crop_coords, keys)


def _fpn_forward(params, x, crop_coords, rng_key, *, level_strides, proj_dim, num_anchors):
    B, C, H, W = x.shape

    # Stand-in FPN backbone levels: average pooling per stride, channels-last rows.
    # TODO(synk): assumes H and W are divisible by every stride (like the demo inputs).
    rows_list, shapes = [], []
    for s in level_strides:
        h, w = H // s, W // s
        pooled = x.reshape(B, C, h, s, w, s).mean(axis=(3, 5))            # (B,C,h,w)
        rows_list.append(pooled.transpose(0, 2, 3, 1).reshape(B * h * w, C))
        shapes.append((h, w))

    # One fused Pallas call over all levels' rows (stem + projection head).
    rows_all = jnp.concatenate(rows_list, axis=0)
    proj_all = _fused_encoder_apply(rows_all, params, proj_dim)           # (M_total, D)

    pos_parts, neg_parts, reduced_fpn = [], [], []
    off = 0
    for li, (h, w) in enumerate(shapes):
        n = B * h * w
        feats = proj_all[off:off + n].reshape(B, h, w, proj_dim)          # NHWC
        off += n
        reduced_fpn.append(feats.transpose(0, 3, 1, 2))                   # NCHW like PyTorch

        gy = jnp.arange(h, dtype=jnp.float32)
        gx = jnp.arange(w, dtype=jnp.float32)
        grid_y, grid_x = jnp.meshgrid(gy, gx, indexing="ij")
        grid_points = jnp.stack([grid_x, grid_y], axis=-1) * (W / h)      # (h,w,2) = (x,y)

        base = jax.random.fold_in(rng_key, li)
        keys = jax.vmap(lambda b: jax.random.fold_in(base, b))(jnp.arange(B))
        pos_b, neg_b = _sample_level(feats, crop_coords, keys, grid_points, num_anchors)
        pos_parts.append(pos_b)                                           # (B, D)
        neg_parts.append(neg_b)                                           # (B, A, D)

    # Same (level-major, batch-minor) stacking / reshape order as the PyTorch module.
    pos_features = jnp.concatenate(pos_parts, axis=0).reshape(B, -1, proj_dim)
    z_j = jnp.mean(pos_features, axis=1)                                  # (B, D)
    neg_features = jnp.concatenate(neg_parts, axis=0).reshape(B, -1, num_anchors, proj_dim)
    z_a = jnp.mean(neg_features, axis=1)                                  # (B, A, D)
    return z_j, z_a, reduced_fpn


# ----------------------------------------------------------------------------
# FPNEncoder (JAX / Pallas port)
# ----------------------------------------------------------------------------
class FPNEncoderPallas:
    FPN_CHANNELS = 256
    HIDDEN = 512

    def __init__(self, proj_dim=32, in_channels=3, level_strides=(4, 8), seed=0):
        self.proj_dim = proj_dim
        self.num_anchors = 10
        self.level_strides = tuple(level_strides)

        k = jax.random.PRNGKey(seed)
        k_stem, k1, k2 = jax.random.split(k, 3)
        Kp = _round_up(max(in_channels, 1), 8)  # sublane padding only (not 128)
        stem_w = jax.random.normal(k_stem, (in_channels, self.FPN_CHANNELS), jnp.float32) * 0.1
        self.params = {
            # Stand-in backbone stem: 1x1 conv in_channels -> 256, pre-padded to 8 rows.
            "stem_w": jnp.zeros((Kp, self.FPN_CHANNELS), jnp.float32).at[:in_channels].set(stem_w),
            "stem_b": jnp.zeros((1, self.FPN_CHANNELS), jnp.float32),
            # proj_head = Conv2d(256,512,1) -> ReLU -> Conv2d(512,proj_dim,1)
            # weights stored bf16 for the MXU; accumulation stays f32 in-kernel.
            "w1": (jax.random.normal(k1, (self.FPN_CHANNELS, self.HIDDEN), jnp.float32)
                   * (1.0 / 16.0)).astype(jnp.bfloat16),
            "b1": jnp.zeros((1, self.HIDDEN), jnp.float32),
            "w2": (jax.random.normal(k2, (self.HIDDEN, proj_dim), jnp.float32)
                   * (1.0 / 22.0)).astype(jnp.bfloat16),
            "b2": jnp.zeros((1, proj_dim), jnp.float32),
        }

        self._fwd = jax.jit(functools.partial(
            _fpn_forward,
            level_strides=self.level_strides,
            proj_dim=self.proj_dim,
            num_anchors=self.num_anchors))

    def __call__(self, x, crop_coords, rng_key):
        # x: (B, C, H, W) NCHW, like the PyTorch module.
        return self._fwd(self.params, x, crop_coords, rng_key)


if __name__ == "__main__":
    key = jax.random.PRNGKey(0)
    kx, kr = jax.random.split(key, 2)

    B, C, H, W = 2, 3, 32, 32
    x = jax.random.normal(kx, (B, C, H, W), jnp.float32)
    # crop_coords rows are (y, x, h_crop, w_crop) in input-image pixels.
    crop_coords = jnp.array([[4.0, 6.0, 10.0, 12.0],
                             [16.0, 8.0, 8.0, 14.0]], dtype=jnp.float32)

    model = FPNEncoderPallas(proj_dim=32, in_channels=C, level_strides=(4, 8))
    z_j, z_a, reduced_fpn = model(x, crop_coords, kr)
    jax.block_until_ready((z_j, z_a, reduced_fpn))

    assert z_j.shape == (B, 32)
    assert z_a.shape == (B, 10, 32)
    assert reduced_fpn[0].shape == (B, 32, 8, 8)
    assert reduced_fpn[1].shape == (B, 32, 4, 4)
    assert bool(jnp.all(jnp.isfinite(z_j))) and bool(jnp.all(jnp.isfinite(z_a)))
    print("KERNEL_OK")
</pallas_src>

<mosaic_0001>
module attributes {stable_mosaic.version = 11 : i64} {
  func.func @_fused_encoder_kernel(%arg0: i32, %arg1: memref<80x8xf32, #tpu.memory_space<vmem>>, %arg2: memref<8x256xf32, #tpu.memory_space<vmem>>, %arg3: memref<1x256xf32, #tpu.memory_space<vmem>>, %arg4: memref<256x512xbf16, #tpu.memory_space<vmem>>, %arg5: memref<1x512xf32, #tpu.memory_space<vmem>>, %arg6: memref<512x32xbf16, #tpu.memory_space<vmem>>, %arg7: memref<1x32xf32, #tpu.memory_space<vmem>>, %arg8: memref<80x32xf32, #tpu.memory_space<vmem>>) attributes {dimension_semantics = [#tpu.dimension_semantics<parallel>], iteration_bounds = array<i64: 2>, scalar_prefetch = 0 : i64, scratch_operands = 0 : i64, tpu.core_type = #tpu.core_type<tc>, window_params = [{transform_indices = @transform_0, window_bounds = array<i64: 80, 8>}, {pipeline_mode = #tpu.pipeline_mode<synchronous>, transform_indices = @transform_1, window_bounds = array<i64: 8, 256>}, {pipeline_mode = #tpu.pipeline_mode<synchronous>, transform_indices = @transform_2, window_bounds = array<i64: 1, 256>}, {pipeline_mode = #tpu.pipeline_mode<synchronous>, transform_indices = @transform_3, window_bounds = array<i64: 256, 512>}, {pipeline_mode = #tpu.pipeline_mode<synchronous>, transform_indices = @transform_4, window_bounds = array<i64: 1, 512>}, {pipeline_mode = #tpu.pipeline_mode<synchronous>, transform_indices = @transform_5, window_bounds = array<i64: 512, 32>}, {pipeline_mode = #tpu.pipeline_mode<synchronous>, transform_indices = @transform_6, window_bounds = array<i64: 1, 32>}, {transform_indices = @transform_7, window_bounds = array<i64: 80, 32>}]} {
    %c0 = arith.constant 0 : index
    %c0_0 = arith.constant 0 : index
    %0 = vector.load %arg1[%c0, %c0_0] : memref<80x8xf32, #tpu.memory_space<vmem>>, vector<80x8xf32>
    %c0_1 = arith.constant 0 : index
    %c0_2 = arith.constant 0 : index
    %1 = vector.load %arg2[%c0_1, %c0_2] : memref<8x256xf32, #tpu.memory_space<vmem>>, vector<8x256xf32>
    %cst = arith.constant dense<0.000000e+00> : vector<80x256xf32>
    %2 = tpu.matmul %0, %1, %cst {dimension_numbers = #tpu.dot_dimension_numbers<[1], [0], [0], [1], [0, 0, 1, 1], [], []>} : vector<80x8xf32>, vector<8x256xf32>, vector<80x256xf32> -> vector<80x256xf32>
    %c0_3 = arith.constant 0 : index
    %c0_4 = arith.constant 0 : index
    %3 = vector.load %arg3[%c0_3, %c0_4] : memref<1x256xf32, #tpu.memory_space<vmem>>, vector<1x256xf32>
    %4 = vector.broadcast %3 : vector<1x256xf32> to vector<80x256xf32>
    %5 = arith.addf %2, %4 : vector<80x256xf32>
    %cst_5 = arith.constant 0.000000e+00 : f32
    %6 = vector.broadcast %cst_5 : f32 to vector<80x256xf32>
    %7 = arith.maximumf %5, %6 : vector<80x256xf32>
    %8 = arith.truncf %7 : vector<80x256xf32> to vector<80x256xbf16>
    %cst_6 = arith.constant 0.000000e+00 : f32
    %9 = vector.broadcast %cst_6 : f32 to vector<80x32xf32>
    %c0_7 = arith.constant 0 : index
    %c0_8 = arith.constant 0 : index
    %10 = vector.load %arg4[%c0_7, %c0_8] : memref<256x512xbf16, #tpu.memory_space<vmem>>, vector<256x128xbf16>
    %cst_9 = arith.constant dense<0.000000e+00> : vector<80x128xf32>
    %11 = tpu.matmul %8, %10, %cst_9 {dimension_numbers = #tpu.dot_dimension_numbers<[1], [0], [0], [1], [0, 0, 1, 1], [], []>} : vector<80x256xbf16>, vector<256x128xbf16>, vector<80x128xf32> -> vector<80x128xf32>
    %c0_10 = arith.constant 0 : index
    %c0_11 = arith.constant 0 : index
    %12 = vector.load %arg5[%c0_10, %c0_11] : memref<1x512xf32, #tpu.memory_space<vmem>>, vector<1x128xf32>
    %13 = vector.broadcast %12 : vector<1x128xf32> to vector<80x128xf32>
    %14 = arith.addf %11, %13 : vector<80x128xf32>
    %cst_12 = arith.constant 0.000000e+00 : f32
    %15 = vector.broadcast %cst_12 : f32 to vector<80x128xf32>
    %16 = arith.maximumf %14, %15 : vector<80x128xf32>
    %17 = arith.truncf %16 : vector<80x128xf32> to vector<80x128xbf16>
    %c0_13 = arith.constant 0 : index
    %c0_14 = arith.constant 0 : index
    %18 = vector.load %arg6[%c0_13, %c0_14] : memref<512x32xbf16, #tpu.memory_space<vmem>>, vector<128x32xbf16>
    %cst_15 = arith.constant dense<0.000000e+00> : vector<80x32xf32>
    %19 = tpu.matmul %17, %18, %cst_15 {dimension_numbers = #tpu.dot_dimension_numbers<[1], [0], [0], [1], [0, 0, 1, 1], [], []>} : vector<80x128xbf16>, vector<128x32xbf16>, vector<80x32xf32> -> vector<80x32xf32>
    %20 = arith.addf %9, %19 : vector<80x32xf32>
    %c0_16 = arith.constant 0 : index
    %c128 = arith.constant 128 : index
    %21 = vector.load %arg4[%c0_16, %c128] : memref<256x512xbf16, #tpu.memory_space<vmem>>, vector<256x128xbf16>
    %cst_17 = arith.constant dense<0.000000e+00> : vector<80x128xf32>
    %22 = tpu.matmul %8, %21, %cst_17 {dimension_numbers = #tpu.dot_dimension_numbers<[1], [0], [0], [1], [0, 0, 1, 1], [], []>} : vector<80x256xbf16>, vector<256x128xbf16>, vector<80x128xf32> -> vector<80x128xf32>
    %c0_18 = arith.constant 0 : index
    %c128_19 = arith.constant 128 : index
    %23 = vector.load %arg5[%c0_18, %c128_19] : memref<1x512xf32, #tpu.memory_space<vmem>>, vector<1x128xf32>
    %24 = vector.broadcast %23 : vector<1x128xf32> to vector<80x128xf32>
    %25 = arith.addf %22, %24 : vector<80x128xf32>
    %cst_20 = arith.constant 0.000000e+00 : f32
    %26 = vector.broadcast %cst_20 : f32 to vector<80x128xf32>
    %27 = arith.maximumf %25, %26 : vector<80x128xf32>
    %28 = arith.truncf %27 : vector<80x128xf32> to vector<80x128xbf16>
    %c128_21 = arith.constant 128 : index
    %c0_22 = arith.constant 0 : index
    %29 = vector.load %arg6[%c128_21, %c0_22] : memref<512x32xbf16, #tpu.memory_space<vmem>>, vector<128x32xbf16>
    %cst_23 = arith.constant dense<0.000000e+00> : vector<80x32xf32>
    %30 = tpu.matmul %28, %29, %cst_23 {dimension_numbers = #tpu.dot_dimension_numbers<[1], [0], [0], [1], [0, 0, 1, 1], [], []>} : vector<80x128xbf16>, vector<128x32xbf16>, vector<80x32xf32> -> vector<80x32xf32>
    %31 = arith.addf %20, %30 : vector<80x32xf32>
    %c0_24 = arith.constant 0 : index
    %c256 = arith.constant 256 : index
    %32 = vector.load %arg4[%c0_24, %c256] : memref<256x512xbf16, #tpu.memory_space<vmem>>, vector<256x128xbf16>
    %cst_25 = arith.constant dense<0.000000e+00> : vector<80x128xf32>
    %33 = tpu.matmul %8, %32, %cst_25 {dimension_numbers = #tpu.dot_dimension_numbers<[1], [0], [0], [1], [0, 0, 1, 1], [], []>} : vector<80x256xbf16>, vector<256x128xbf16>, vector<80x128xf32> -> vector<80x128xf32>
    %c0_26 = arith.constant 0 : index
    %c256_27 = arith.constant 256 : index
    %34 = vector.load %arg5[%c0_26, %c256_27] : memref<1x512xf32, #tpu.memory_space<vmem>>, vector<1x128xf32>
    %35 = vector.broadcast %34 : vector<1x128xf32> to vector<80x128xf32>
    %36 = arith.addf %33, %35 : vector<80x128xf32>
    %cst_28 = arith.constant 0.000000e+00 : f32
    %37 = vector.broadcast %cst_28 : f32 to vector<80x128xf32>
    %38 = arith.maximumf %36, %37 : vector<80x128xf32>
    %39 = arith.truncf %38 : vector<80x128xf32> to vector<80x128xbf16>
    %c256_29 = arith.constant 256 : index
    %c0_30 = arith.constant 0 : index
    %40 = vector.load %arg6[%c256_29, %c0_30] : memref<512x32xbf16, #tpu.memory_space<vmem>>, vector<128x32xbf16>
    %cst_31 = arith.constant dense<0.000000e+00> : vector<80x32xf32>
    %41 = tpu.matmul %39, %40, %cst_31 {dimension_numbers = #tpu.dot_dimension_numbers<[1], [0], [0], [1], [0, 0, 1, 1], [], []>} : vector<80x128xbf16>, vector<128x32xbf16>, vector<80x32xf32> -> vector<80x32xf32>
    %42 = arith.addf %31, %41 : vector<80x32xf32>
    %c0_32 = arith.constant 0 : index
    %c384 = arith.constant 384 : index
    %43 = vector.load %arg4[%c0_32, %c384] : memref<256x512xbf16, #tpu.memory_space<vmem>>, vector<256x128xbf16>
    %cst_33 = arith.constant dense<0.000000e+00> : vector<80x128xf32>
    %44 = tpu.matmul %8, %43, %cst_33 {dimension_numbers = #tpu.dot_dimension_numbers<[1], [0], [0], [1], [0, 0, 1, 1], [], []>} : vector<80x256xbf16>, vector<256x128xbf16>, vector<80x128xf32> -> vector<80x128xf32>
    %c0_34 = arith.constant 0 : index
    %c384_35 = arith.constant 384 : index
    %45 = vector.load %arg5[%c0_34, %c384_35] : memref<1x512xf32, #tpu.memory_space<vmem>>, vector<1x128xf32>
    %46 = vector.broadcast %45 : vector<1x128xf32> to vector<80x128xf32>
    %47 = arith.addf %44, %46 : vector<80x128xf32>
    %cst_36 = arith.constant 0.000000e+00 : f32
    %48 = vector.broadcast %cst_36 : f32 to vector<80x128xf32>
    %49 = arith.maximumf %47, %48 : vector<80x128xf32>
    %50 = arith.truncf %49 : vector<80x128xf32> to vector<80x128xbf16>
    %c384_37 = arith.constant 384 : index
    %c0_38 = arith.constant 0 : index
    %51 = vector.load %arg6[%c384_37, %c0_38] : memref<512x32xbf16, #tpu.memory_space<vmem>>, vector<128x32xbf16>
    %cst_39 = arith.constant dense<0.000000e+00> : vector<80x32xf32>
    %52 = tpu.matmul %50, %51, %cst_39 {dimension_numbers = #tpu.dot_dimension_numbers<[1], [0], [0], [1], [0, 0, 1, 1], [], []>} : vector<80x128xbf16>, vector<128x32xbf16>, vector<80x32xf32> -> vector<80x32xf32>
    %53 = arith.addf %42, %52 : vector<80x32xf32>
    %c0_40 = arith.constant 0 : index
    %c0_41 = arith.constant 0 : index
    %54 = vector.load %arg7[%c0_40, %c0_41] : memref<1x32xf32, #tpu.memory_space<vmem>>, vector<1x32xf32>
    %55 = vector.broadcast %54 : vector<1x32xf32> to vector<80x32xf32>
    %56 = arith.addf %53, %55 : vector<80x32xf32>
    %c0_42 = arith.constant 0 : index
    %c0_43 = arith.constant 0 : index
    %57 = vector.load %arg8[%c0_42, %c0_43] : memref<80x32xf32, #tpu.memory_space<vmem>>, vector<80x32xf32>
    tpu.vector_store %arg8[%c0_42, %c0_43], %56 {strides = array<i32>} : memref<80x32xf32, #tpu.memory_space<vmem>>, vector<80x32xf32>,
    return
  }
  func.func @transform_0(%arg0: i32) -> (i32, i32) {
    %c0_i32 = arith.constant 0 : i32
    %c0_i32_0 = arith.constant 0 : i32
    return %arg0, %c0_i32 : i32, i32
  }
  func.func @transform_1(%arg0: i32) -> (i32, i32) {
    %c0_i32 = arith.constant 0 : i32
    %c0_i32_0 = arith.constant 0 : i32
    %c0_i32_1 = arith.constant 0 : i32
    return %c0_i32, %c0_i32_0 : i32, i32
  }
  func.func @transform_2(%arg0: i32) -> (i32, i32) {
    %c0_i32 = arith.constant 0 : i32
    %c0_i32_0 = arith.constant 0 : i32
    %c0_i32_1 = arith.constant 0 : i32
    return %c0_i32, %c0_i32_0 : i32, i32
  }
  func.func @transform_3(%arg0: i32) -> (i32, i32) {
    %c0_i32 = arith.constant 0 : i32
    %c0_i32_0 = arith.constant 0 : i32
    %c0_i32_1 = arith.constant 0 : i32
    return %c0_i32, %c0_i32_0 : i32, i32
  }
  func.func @transform_4(%arg0: i32) -> (i32, i32) {
    %c0_i32 = arith.constant 0 : i32
    %c0_i32_0 = arith.constant 0 : i32
    %c0_i32_1 = arith.constant 0 : i32
    return %c0_i32, %c0_i32_0 : i32, i32
  }
  func.func @transform_5(%arg0: i32) -> (i32, i32) {
    %c0_i32 = arith.constant 0 : i32
    %c0_i32_0 = arith.constant 0 : i32
    %c0_i32_1 = arith.constant 0 : i32
    return %c0_i32, %c0_i32_0 : i32, i32
  }
  func.func @transform_6(%arg0: i32) -> (i32, i32) {
    %c0_i32 = arith.constant 0 : i32
    %c0_i32_0 = arith.constant 0 : i32
    %c0_i32_1 = arith.constant 0 : i32
    return %c0_i32, %c0_i32_0 : i32, i32
  }
  func.func @transform_7(%arg0: i32) -> (i32, i32) {
    %c0_i32 = arith.constant 0 : i32
    %c0_i32_0 = arith.constant 0 : i32
    return %arg0, %c0_i32 : i32, i32
  }
}

</mosaic_0001>

<bundles_post_ra>
// kernel: _fpn_forward.1
= control target key start
LH: loop header
LB: loop body
LE: loop exit
PB: predicated region body
PF: predicated region fallthrough
CT: control target
= control target key end

     0   :  { %s2380_s24 = smov 0   ;;  %s3116_s0 = inlined_call_operand.vmem [shape: f32[160,8], index: 0, kind: input, shape index: {}]   ;;  %s3117_s1 = inlined_call_operand.vmem [shape: f32[8,256], index: 1, kind: input, shape index: {}]   ;;  %s3118_s2 = inlined_call_operand.vmem [shape: f32[1,256], index: 2, kind: input, shape index: {}]   ;;  %s3119_s3 = inlined_call_operand.vmem [shape: bf16[256,512], index: 3, kind: input, shape index: {}]   ;;  %s3120_s4 = inlined_call_operand.vmem [shape: f32[1,512], index: 4, kind: input, shape index: {}]   ;;  %s3121_s5 = inlined_call_operand.vmem [shape: bf16[512,32], index: 5, kind: input, shape index: {}]   ;;  %s3122_s6 = inlined_call_operand.vmem [shape: f32[1,32], index: 6, kind: input, shape index: {}]   ;;  %s3123_s7 = inlined_call_operand.vmem [shape: f32[160,32], index: 7, kind: output, shape index: {}]  }
   0x1 LB: > { %s1808_s25 = sadd.s32 4294967295, %s2338_s24   ;;  %p1812_p0 = scmp.ge.s32.totalorder %s2338_s24, 1  ;;  %s2338_s24 = sphi %s2380_s24, %s17_s24  }
   0x2   : > { %p238_p1 = scmp.lt.s32.totalorder %s2338_s24, 3 }
   0x4   : > { %p239_p2 = pnand %p1812_p0, %p238_p1 }
   0x5   : > { %s270_s30 = smul.u32 (!%p239_p2), 10, %s1808_s25 }
   0x6   : > { %242 = sbr.rel (%p239_p2) target bundleno = 734 (0x2de), region = 48 }
   0x7   : > { %p271_p3 = scmp.lt.s32.totalorder (!%p239_p2), %s270_s30, 19 }
   0xb   : > { %v292_v0 = vld [vmem:[%s3117_s1] sm:$0xff]  ;;  %v293_v1 = vld [vmem:[%s3117_s1 + $0x8] sm:$0xff]  ;;  %s3125_s30 = smov (!%p271_p3, %s270_s30), 19  ;;  %vm300_vm0 = vcmask 64512   ;;  %v2228_v8 = vld [vmem:[%s3119_s3 + $0xec] sm:$0xf0] }
   0xc   : > { %346 = vmatpush.msra.mxu0 %v292_v0  ;;  %393 = vmatpush.msra.mxu1 %v293_v1  ;;  %s1813_s8 = sshll.u32 %s3125_s30, 3  ;;  %v1865_v7 = vld [vmem:[%s3119_s3 + $0xe0] sm:$0xf]  ;;  %v2236_v11 = vld [vmem:[%s3119_s3 + $0x1ec] sm:$0xf0]  ;;  %vm1741_vm1 = vcmask 261120  }
   0xd   : > { %2317 = vmatpush.msra.mxu2 %v292_v0  ;;  %2318 = vmatpush.msra.mxu3 %v293_v1  ;;  %s2402_s11 = scalar_lea.vmem %s3116_s0, %s1813_s8  ;;  %v1866_v9 = vor.u32 %v2228_v8, %v1865_v7  ;;  %v1897_v10 = vld [vmem:[%s3119_s3 + $0x1e0] sm:$0xf]  ;;  %v2227_v13 = vld [vmem:[%s3119_s3 + $0xcc] sm:$0xf0]  ;;  %v1929_v17 = vld [vmem:[%s3119_s3 + $0xe4] sm:$0xf]  ;;  %s3082_s9 = scalar_lea.vmem %s3123_s7, %s1813_s8 }
   0xe   : > { %v282_v2 = vld [vmem:[%s2402_s11] sm:$0xff]  ;;  %v287_v4 = vld [vmem:[%s2402_s11 + $0x28] sm:$0xff]  ;;  %v288_v6 = vld [vmem:[%s2402_s11 + $0x30] sm:$0xff]  ;;  %v1898_v14 = vor.u32 %v2236_v11, %v1897_v10 }
   0xf   : > { %1815 = vmatmul.msk.f32.vlgmr.msra.gmra.mxu0 %vm300_vm0, %v282_v2  ;;  %1825 = vmatmul.msk.f32.vlgmr.msra.gmra.mxu1 %vm300_vm0, %v282_v2  ;;  %v2408_v3 = vld [vmem:[%s2402_s11 + $0x20] sm:$0xff]  ;;  %v283_v5 = vld [vmem:[%s2402_s11 + $0x8] sm:$0xff]  ;;  %v2235_v16 = vld [vmem:[%s3119_s3 + $0x1cc] sm:$0xf0] }
  0x10   : > { %1819 = vmatmul.msk.f32.vlgmr.msra.gmra.mxu2 %vm300_vm0, %v2408_v3  ;;  %1830 = vmatmul.msk.f32.vlgmr.msra.gmra.mxu3 %vm300_vm0, %v287_v4  ;;  %v1861_v12 = vld [vmem:[%s3119_s3 + $0xc0] sm:$0xf]  ;;  %v2252_v18 = vld [vmem:[%s3119_s3 + $0xf0] sm:$0xf0]  ;;  %v1961_v21 = vld [vmem:[%s3119_s3 + $0x1e4] sm:$0xf] }
  0x11   : > { %v1893_v15 = vld [vmem:[%s3119_s3 + $0x1c0] sm:$0xf]  ;;  %587 = vmatpush.bf16.msrb.mxu2 %v1866_v9  ;;  %v284_v19 = vld [vmem:[%s2402_s11 + $0x10] sm:$0xff]  ;;  %621 = vmatpush.bf16.msrb.mxu3 %v1898_v14  ;;  %v1930_v20 = vor.u32 %v2252_v18, %v1929_v17  ;;  %v1862_v23 = vor.u32 %v2227_v13, %v1861_v12  ;;  %v1925_v30 = vld [vmem:[%s3119_s3 + $0xc4] sm:$0xf] }
  0x12   : > { %v2260_v22 = vld [vmem:[%s3119_s3 + $0x1f0] sm:$0xf0]  ;;  %v1857_v24 = vld [vmem:[%s3119_s3 + $0xa0] sm:$0xf]  ;;  %v2226_v25 = vld [vmem:[%s3119_s3 + $0xac] sm:$0xf0]  ;;  %v1894_v26 = vor.u32 %v2235_v16, %v1893_v15 }
  0x13   : > { %v1889_v27 = vld [vmem:[%s3119_s3 + $0x1a0] sm:$0xf]  ;;  %818 = vmatpush.bf16.msrb.mxu0 %v1930_v20  ;;  %v1962_v28 = vor.u32 %v2260_v22, %v1961_v21  ;;  %v2234_v29 = vld [vmem:[%s3119_s3 + $0x1ac] sm:$0xf0]  ;;  %v2251_v31 = vld [vmem:[%s3119_s3 + $0xd0] sm:$0xf0]  ;;  %v1858_v37 = vor.u32 %v2226_v25, %v1857_v24 }
  0x14   : > { %v289_v32 = vld [vmem:[%s2402_s11 + $0x38] sm:$0xff]  ;;  %v1926_v33 = vor.u32 %v2251_v31, %v1925_v30  ;;  %v1957_v34 = vld [vmem:[%s3119_s3 + $0x1c4] sm:$0xf]  ;;  %v2259_v35 = vld [vmem:[%s3119_s3 + $0x1d0] sm:$0xf0]  ;;  %v1890_v40 = vor.u32 %v2234_v29, %v1889_v27 }
  0x15   : > { %v1921_v36 = vld [vmem:[%s3119_s3 + $0xa4] sm:$0xf]  ;;  %588 = vmatpush.bf16.msrb.mxu2 %v1862_v23  ;;  %622 = vmatpush.bf16.msrb.mxu3 %v1894_v26  ;;  %v1853_v38 = vld [vmem:[%s3119_s3 + $0x80] sm:$0xf]  ;;  %v2225_v39 = vld [vmem:[%s3119_s3 + $0x8c] sm:$0xf0]  ;;  %v1958_v42 = vor.u32 %v2259_v35, %v1957_v34 }
  0x16   : > { %v2250_v41 = vld [vmem:[%s3119_s3 + $0xb0] sm:$0xf0]  ;;  %852 = vmatpush.bf16.msrb.mxu1 %v1962_v28  ;;  %v1885_v43 = vld [vmem:[%s3119_s3 + $0x180] sm:$0xf]  ;;  %v2233_v44 = vld [vmem:[%s3119_s3 + $0x18c] sm:$0xf0]  ;;  %v1854_v51 = vor.u32 %v2225_v39, %v1853_v38 }
  0x17   : > { %1816 = vmatmul.msk.f32.gmra.mxu0 %vm300_vm0, %v283_v5  ;;  %1826 = vmatmul.msk.f32.gmra.mxu1 %vm300_vm0, %v283_v5  ;;  %v1922_v45 = vor.u32 %v2250_v41, %v1921_v36  ;;  %v1953_v46 = vld [vmem:[%s3119_s3 + $0x1a4] sm:$0xf]  ;;  %v2258_v47 = vld [vmem:[%s3119_s3 + $0x1b0] sm:$0xf0]  ;;  %v285_v50 = vld [vmem:[%s2402_s11 + $0x18] sm:$0xff]  ;;  %v1886_v53 = vor.u32 %v2233_v44, %v1885_v43 }
  0x18   : > { %1820 = vmatmul.msk.f32.gmra.mxu2 %vm300_vm0, %v287_v4  ;;  %1831 = vmatmul.msk.f32.gmra.mxu3 %vm300_vm0, %v288_v6  ;;  %v1917_v48 = vld [vmem:[%s3119_s3 + $0x84] sm:$0xf]  ;;  %v2249_v49 = vld [vmem:[%s3119_s3 + $0x90] sm:$0xf0]  ;;  %v1849_v52 = vld [vmem:[%s3119_s3 + $0x60] sm:$0xf]  ;;  %v1954_v55 = vor.u32 %v2258_v47, %v1953_v46 }
  0x19   : > { %819 = vmatpush.bf16.msrb.mxu0 %v1926_v33  ;;  %589 = vmatpush.bf16.msrb.mxu2 %v1858_v37  ;;  %v2224_v54 = vld [vmem:[%s3119_s3 + $0x6c] sm:$0xf0]  ;;  %v1918_v56 = vor.u32 %v2249_v49, %v1917_v48  ;;  %v1881_v57 = vld [vmem:[%s3119_s3 + $0x160] sm:$0xf]  ;;  %v1949_v60 = vld [vmem:[%s3119_s3 + $0x184] sm:$0xf] }
  0x1a   : > { %623 = vmatpush.bf16.msrb.mxu3 %v1890_v40  ;;  %853 = vmatpush.bf16.msrb.mxu1 %v1958_v42  ;;  %v2232_v58 = vld [vmem:[%s3119_s3 + $0x16c] sm:$0xf0]  ;;  %v290_v59 = vld [vmem:[%s2402_s11 + $0x40] sm:$0xff]  ;;  %v2257_v61 = vld [vmem:[%s3119_s3 + $0x190] sm:$0xf0]  ;;  %v1850_v62 = vor.u32 %v2224_v54, %v1849_v52 }
  0x1b   : > { %v1882_v63 = vor.u32 %v2232_v58, %v1881_v57  ;;  %v1950_v0 = vor.u32 %v2257_v61, %v1949_v60  ;;  %v1845_v1 = vld [vmem:[%s3119_s3 + $0x40] sm:$0xf]  ;;  %v2223_v2 = vld [vmem:[%s3119_s3 + $0x4c] sm:$0xf0]  ;;  %v291_v5 = vld [vmem:[%s2402_s11 + $0x48] sm:$0xff] }
  0x1c   : > { %v1846_v4 = vor.u32 %v2223_v2, %v1845_v1  ;;  %v2248_v7 = vld [vmem:[%s3119_s3 + $0x70] sm:$0xf0]  ;;  %v1877_v11 = vld [vmem:[%s3119_s3 + $0x140] sm:$0xf]  ;;  %v2231_v12 = vld [vmem:[%s3119_s3 + $0x14c] sm:$0xf0] }
  0x1d   : > { %820 = vmatpush.bf16.msrb.mxu0 %v1922_v45  ;;  %590 = vmatpush.bf16.msrb.mxu2 %v1854_v51  ;;  %v2256_v9 = vld [vmem:[%s3119_s3 + $0x170] sm:$0xf0]  ;;  %v1878_v13 = vor.u32 %v2231_v12, %v1877_v11  ;;  %v1909_v14 = vld [vmem:[%s3119_s3 + $0x44] sm:$0xf]  ;;  %v1841_v17 = vld [vmem:[%s3119_s3 + $0x20] sm:$0xf] }
  0x1e   : > { %624 = vmatpush.bf16.msrb.mxu3 %v1886_v53  ;;  %854 = vmatpush.bf16.msrb.mxu1 %v1954_v55  ;;  %v2247_v15 = vld [vmem:[%s3119_s3 + $0x50] sm:$0xf0]  ;;  %v1941_v16 = vld [vmem:[%s3119_s3 + $0x144] sm:$0xf]  ;;  %v2222_v18 = vld [vmem:[%s3119_s3 + $0x2c] sm:$0xf0] }
  0x1f   : > { %1817 = vmatmul.msk.f32.gmra.mxu0 %vm300_vm0, %v284_v19  ;;  %1827 = vmatmul.msk.f32.gmra.mxu1 %vm300_vm0, %v284_v19  ;;  %v1910_v19 = vor.u32 %v2247_v15, %v1909_v14  ;;  %v2255_v20 = vld [vmem:[%s3119_s3 + $0x150] sm:$0xf0]  ;;  %v1842_v21 = vor.u32 %v2222_v18, %v1841_v17  ;;  %v1873_v23 = vld [vmem:[%s3119_s3 + $0x120] sm:$0xf]  ;;  %v2230_v24 = vld [vmem:[%s3119_s3 + $0x12c] sm:$0xf0] }
  0x20   : > { %1821 = vmatmul.msk.f32.gmra.mxu2 %vm300_vm0, %v288_v6  ;;  %1832 = vmatmul.msk.f32.gmra.mxu3 %vm300_vm0, %v289_v32  ;;  %v1913_v6 = vld [vmem:[%s3119_s3 + $0x64] sm:$0xf]  ;;  %v1942_v22 = vor.u32 %v2255_v20, %v1941_v16  ;;  %v1874_v25 = vor.u32 %v2230_v24, %v1873_v23  ;;  %v2246_v27 = vld [vmem:[%s3119_s3 + $0x30] sm:$0xf0]  ;;  %v2221_v33 = vld [vmem:[%s3119_s3 + $0xc] sm:$0xf0] }
  0x21   : > { %821 = vmatpush.bf16.msrb.mxu0 %v1918_v56  ;;  %591 = vmatpush.bf16.msrb.mxu2 %v1850_v62  ;;  %v1914_v8 = vor.u32 %v2248_v7, %v1913_v6  ;;  %v1905_v26 = vld [vmem:[%s3119_s3 + $0x24] sm:$0xf]  ;;  %v2254_v30 = vld [vmem:[%s3119_s3 + $0x130] sm:$0xf0]  ;;  %v1869_v34 = vld [vmem:[%s3119_s3 + $0x100] sm:$0xf] }
  0x22   : > { %625 = vmatpush.bf16.msrb.mxu3 %v1882_v63  ;;  %855 = vmatpush.bf16.msrb.mxu1 %v1950_v0  ;;  %v1937_v28 = vld [vmem:[%s3119_s3 + $0x124] sm:$0xf]  ;;  %v1906_v29 = vor.u32 %v2246_v27, %v1905_v26  ;;  %v2229_v36 = vld [vmem:[%s3119_s3 + $0x10c] sm:$0xf0]  ;;  %v2245_v38 = vld [vmem:[%s3119_s3 + $0x10] sm:$0xf0] }
  0x23   : > { %v1938_v31 = vor.u32 %v2254_v30, %v1937_v28  ;;  %v1901_v37 = vld [vmem:[%s3119_s3 + $0x4] sm:$0xf]  ;;  %v1870_v39 = vor.u32 %v2229_v36, %v1869_v34  ;;  %v2253_v42 = vld [vmem:[%s3119_s3 + $0x110] sm:$0xf0]  ;;  %v294_v44 = vld [vmem:[%s3118_s2] sm:$0x3] }
  0x24   : > { %v1902_v40 = vor.u32 %v2245_v38, %v1901_v37  ;;  %v1933_v41 = vld [vmem:[%s3119_s3 + $0x104] sm:$0xf]  ;;  %v2633_v47 = vperm.slane %v294_v44, 0  ;;  %v2635_v48 = vperm.slane %v294_v44, 1  ;;  %v2057_v14 = vld [vmem:[%s3119_s3 + $0xe8] sm:$0xf] }
  0x25   : > { %592 = vmatpush.bf16.msrb.mxu2 %v1846_v4  ;;  %822 = vmatpush.bf16.msrb.mxu0 %v1914_v8  ;;  %v1934_v43 = vor.u32 %v2253_v42, %v1933_v41  ;;  %v2276_v15 = vld [vmem:[%s3119_s3 + $0xf4] sm:$0xf0]  ;;  %v2089_v16 = vld [vmem:[%s3119_s3 + $0x1e8] sm:$0xf] }
  0x26   : > { %626 = vmatpush.bf16.msrb.mxu3 %v1878_v13  ;;  %v2058_v17 = vor.u32 %v2276_v15, %v2057_v14  ;;  %v2284_v18 = vld [vmem:[%s3119_s3 + $0x1f4] sm:$0xf0]  ;;  %v2085_v23 = vld [vmem:[%s3119_s3 + $0x1c8] sm:$0xf] }
  0x27   : > { %1818 = vmatmul.msk.f32.gmra.mxu0 %vm300_vm0, %v285_v50  ;;  %1828 = vmatmul.msk.f32.gmra.mxu1 %vm300_vm0, %v285_v50  ;;  %v2090_v20 = vor.u32 %v2284_v18, %v2089_v16  ;;  %v2049_v27 = vld [vmem:[%s3119_s3 + $0xa8] sm:$0xf]  ;;  %v2274_v28 = vld [vmem:[%s3119_s3 + $0xb4] sm:$0xf0] }
  0x28   : > { %1822 = vmatmul.msk.f32.gmra.mxu2 %vm300_vm0, %v289_v32  ;;  %1833 = vmatmul.msk.f32.gmra.mxu3 %vm300_vm0, %v290_v59  ;;  %v1837_v32 = vld [vmem:[%s3119_s3] sm:$0xf]  ;;  %v2050_v37 = vor.u32 %v2274_v28, %v2049_v27  ;;  %v2281_v44 = vld [vmem:[%s3119_s3 + $0x194] sm:$0xf0] }
  0x29   : > { %823 = vmatpush.bf16.msrb.mxu0 %v1910_v19  ;;  %593 = vmatpush.bf16.msrb.mxu2 %v1842_v21  ;;  %v1838_v35 = vor.u32 %v2221_v33, %v1837_v32  ;;  %v2053_v21 = vld [vmem:[%s3119_s3 + $0xc8] sm:$0xf]  ;;  %v2282_v32 = vld [vmem:[%s3119_s3 + $0x1b4] sm:$0xf0] }
  0x2a   : > { %627 = vmatpush.bf16.msrb.mxu3 %v1874_v25  ;;  %v2283_v25 = vld [vmem:[%s3119_s3 + $0x1d4] sm:$0xf0] }
  0x2b   : > { %v2086_v26 = vor.u32 %v2283_v25, %v2085_v23 }
  0x2d   : > { %824 = vmatpush.bf16.msrb.mxu0 %v1906_v29  ;;  %594 = vmatpush.bf16.msrb.mxu2 %v1838_v35 }
  0x2e   : > { %628 = vmatpush.bf16.msrb.mxu3 %v1870_v39  ;;  %v2045_v39 = vld [vmem:[%s3119_s3 + $0x88] sm:$0xf] }
  0x2f   : > { %1829 = vmatmul.msk.f32.gmra.mxu1 %vm300_vm0, %v2408_v3  ;;  %v1945_v3 = vld [vmem:[%s3119_s3 + $0x164] sm:$0xf] }
  0x30   : > { %1823 = vmatmul.msk.f32.gmra.mxu2 %vm300_vm0, %v290_v59  ;;  %1834 = vmatmul.msk.f32.gmra.mxu3 %vm300_vm0, %v291_v5  ;;  %v1946_v10 = vor.u32 %v2256_v9, %v1945_v3 }
  0x31   : > { %825 = vmatpush.bf16.msrb.mxu0 %v1902_v40  ;;  %v2273_v40 = vld [vmem:[%s3119_s3 + $0x94] sm:$0xf0] }
  0x32   : > { %856 = vmatpush.bf16.msrb.mxu1 %v1946_v10 }
  0x35   : > { %1213 = vmatpush.bf16.msra.mxu0 %v2058_v17 }
  0x36   : > { %857 = vmatpush.bf16.msrb.mxu1 %v1942_v22  ;;  %v2275_v22 = vld [vmem:[%s3119_s3 + $0xd4] sm:$0xf0] }
  0x37   : > { %v2054_v24 = vor.u32 %v2275_v22, %v2053_v21  ;;  %v2061_v21 = vld [vmem:[%s3119_s3 + $0x108] sm:$0xf]  ;;  %v2277_v22 = vld [vmem:[%s3119_s3 + $0x114] sm:$0xf0] }
  0x38   : > { %1824 = vmatmul.msk.f32.gmra.mxu2 %vm300_vm0, %v291_v5 }
  0x39   : > { %1214 = vmatpush.bf16.msra.mxu0 %v2054_v24 }
  0x3a   : > { %858 = vmatpush.bf16.msrb.mxu1 %v1938_v31  ;;  %v2081_v31 = vld [vmem:[%s3119_s3 + $0x1a8] sm:$0xf] }
  0x3b   : > { %v2082_v38 = vor.u32 %v2282_v32, %v2081_v31 }
  0x3d   : > { %1215 = vmatpush.bf16.msra.mxu0 %v2050_v37 }
  0x3e   : > { %859 = vmatpush.bf16.msrb.mxu1 %v1934_v43  ;;  %v2077_v43 = vld [vmem:[%s3119_s3 + $0x188] sm:$0xf] }
  0x42   : > { %1247 = vmatpush.bf16.msra.mxu1 %v2090_v20  ;;  %v2269_v20 = vld [vmem:[%s3119_s3 + $0x14] sm:$0xf0] }
  0x46   : > { %1248 = vmatpush.bf16.msra.mxu1 %v2086_v26 }
  0x4a   : > { %1249 = vmatpush.bf16.msra.mxu1 %v2082_v38 }
  0x8c   : > { %v348_v45 = vpop.f32.mrf.mxu0  ;;  %v395_v46 = vpop.f32.mrf.mxu1 }
  0x8d   : > { %v349_v49 = vadd.f32 %v348_v45, %v2633_v47  ;;  %v396_v50 = vadd.f32 %v395_v46, %v2635_v48 }
  0x8f   : > { %v425_v55 = vmax.f32 %v349_v49, 0.0  ;;  %v426_v56 = vmax.f32 %v396_v50, 0.0  ;;  %v2046_v49 = vor.u32 %v2273_v40, %v2045_v39  ;;  %v2078_v50 = vor.u32 %v2281_v44, %v2077_v43 }
  0x91   : > { %1216 = vmatpush.bf16.msra.mxu0 %v2046_v49  ;;  %1250 = vmatpush.bf16.msra.mxu1 %v2078_v50  ;;  %v2267_v49 = vld [vmem:[%s3121_s5 + $0x70] sm:$0xff] }
  0x92   : > { %v2239_v50 = vld [vmem:[%s3121_s5 + $0x10] sm:$0xff] }
  0x93   : > { %v360_v61 = vpop.f32.mrf.mxu2  ;;  %v410_v3 = vpop.f32.mrf.mxu3 }
  0x94   : > { %v351_v51 = vpop.f32.mrf.mxu0  ;;  %v398_v52 = vpop.f32.mrf.mxu1  ;;  %v411_v29 = vadd.f32 %v410_v3, %v2635_v48  ;;  %v361_v35 = vadd.f32 %v360_v61, %v2633_v47  ;;  %v2280_v61 = vld [vmem:[%s3119_s3 + $0x174] sm:$0xf0] }
  0x95   : > { %v352_v53 = vadd.f32 %v351_v51, %v2633_v47  ;;  %v399_v54 = vadd.f32 %v398_v52, %v2635_v48  ;;  %v2270_v3 = vld [vmem:[%s3119_s3 + $0x34] sm:$0xf0] }
  0x96   : > { %v436_v41 = vmax.f32 %v411_v29, 0.0  ;;  %v433_v45 = vmax.f32 %v361_v35, 0.0 }
  0x97   : > { %v427_v57 = vmax.f32 %v352_v53, 0.0  ;;  %v428_v58 = vmax.f32 %v399_v54, 0.0 }
  0x99   : > { %v2641_v59 = vpack.c.bf16 %v427_v57, %v425_v55  ;;  %v2643_v60 = vpack.c.bf16 %v428_v58, %v426_v56  ;;  %v2041_v55 = vld [vmem:[%s3119_s3 + $0x68] sm:$0xf]  ;;  %v2272_v56 = vld [vmem:[%s3119_s3 + $0x74] sm:$0xf0] }
  0x9a   : > { %v2073_v57 = vld [vmem:[%s3119_s3 + $0x168] sm:$0xf]  ;;  %v2042_v58 = vor.u32 %v2272_v56, %v2041_v55  ;;  %v2264_v55 = vld [vmem:[%s3121_s5 + $0x58] sm:$0xff]  ;;  %v2185_v56 = vld [vmem:[%s3119_s3 + $0x1ec] sm:$0xf] }
  0x9b   : > { %595 = vmatmul.bf16.vlgmr.msrb.gmra.mxu2 %v2641_v59  ;;  %629 = vmatmul.bf16.vlgmr.msrb.gmra.mxu3 %v2643_v60  ;;  %v363_v7 = vpop.f32.mrf.mxu2  ;;  %v413_v34 = vpop.f32.mrf.mxu3 }
  0x9c   : > { %826 = vmatmul.bf16.vlgmr.msrb.gmra.mxu0 %v2641_v59  ;;  %860 = vmatmul.bf16.vlgmr.msrb.gmra.mxu1 %v2643_v60  ;;  %v354_v62 = vpop.f32.mrf.mxu0  ;;  %v401_v63 = vpop.f32.mrf.mxu1  ;;  %v364_v36 = vadd.f32 %v363_v7, %v2633_v47  ;;  %v2033_v7 = vld [vmem:[%s3119_s3 + $0x28] sm:$0xf] }
  0x9d   : > { %v355_v0 = vadd.f32 %v354_v62, %v2633_v47  ;;  %v402_v1 = vadd.f32 %v401_v63, %v2635_v48  ;;  %v2074_v62 = vor.u32 %v2280_v61, %v2073_v57  ;;  %v2244_v63 = vld [vmem:[%s3121_s5 + $0x38] sm:$0xff]  ;;  %1217 = vmatpush.bf16.msra.mxu0 %v2042_v58  ;;  %v2034_v17 = vor.u32 %v2270_v3, %v2033_v7  ;;  %v2263_v61 = vld [vmem:[%s3121_s5 + $0x50] sm:$0xff]  ;;  %v2261_v7 = vld [vmem:[%s3121_s5 + $0x40] sm:$0xff] }
  0x9e   : > { %v435_v46 = vmax.f32 %v364_v36, 0.0  ;;  %1047 = vmatpush.bf16.msra.mxu3 %v2244_v63  ;;  %v2308_v57 = vld [vmem:[%s3119_s3 + $0x1f8] sm:$0xf0]  ;;  %v2181_v63 = vld [vmem:[%s3119_s3 + $0x1cc] sm:$0xf] }
  0x9f   : > { %v429_v8 = vmax.f32 %v355_v0, 0.0  ;;  %v430_v9 = vmax.f32 %v402_v1, 0.0  ;;  %v2037_v0 = vld [vmem:[%s3119_s3 + $0x48] sm:$0xf]  ;;  %v2271_v1 = vld [vmem:[%s3119_s3 + $0x54] sm:$0xf0]  ;;  %1251 = vmatpush.bf16.msra.mxu1 %v2074_v62  ;;  %v2186_v58 = vor.u32 %v2308_v57, %v2185_v56 }
  0xa0   : > { %v2715_v52 = vpack.c.bf16 %v435_v46, %v433_v45  ;;  %v2240_v46 = vld [vmem:[%s3121_s5 + $0x18] sm:$0xff]  ;;  %v2238_v62 = vld [vmem:[%s3121_s5 + $0x8] sm:$0xff] }
  0xa1   : > { %v2173_v3 = vld [vmem:[%s3119_s3 + $0x18c] sm:$0xf] }
  0xa3   : > { %v366_v33 = vpop.f32.mrf.mxu2  ;;  %v416_v54 = vpop.f32.mrf.mxu3 }
  0xa4   : > { %v357_v2 = vpop.f32.mrf.mxu0  ;;  %v404_v4 = vpop.f32.mrf.mxu1  ;;  %v367_v14 = vadd.f32 %v366_v33, %v2633_v47  ;;  %v417_v16 = vadd.f32 %v416_v54, %v2635_v48  ;;  %v2242_v33 = vld [vmem:[%s3121_s5 + $0x28] sm:$0xff]  ;;  %v2265_v54 = vld [vmem:[%s3121_s5 + $0x60] sm:$0xff] }
  0xa5   : > { %v358_v5 = vadd.f32 %v357_v2, %v2633_v47  ;;  %v405_v6 = vadd.f32 %v404_v4, %v2635_v48  ;;  %v2038_v2 = vor.u32 %v2271_v1, %v2037_v0  ;;  %v2069_v4 = vld [vmem:[%s3119_s3 + $0x148] sm:$0xf]  ;;  %v2307_v0 = vld [vmem:[%s3119_s3 + $0x1d8] sm:$0xf0] }
  0xa6   : > { %v437_v26 = vmax.f32 %v367_v14, 0.0  ;;  %v440_v28 = vmax.f32 %v417_v16, 0.0  ;;  %v2182_v1 = vor.u32 %v2307_v0, %v2181_v63  ;;  %v2304_v14 = vld [vmem:[%s3119_s3 + $0x178] sm:$0xf0]  ;;  %v2165_v16 = vld [vmem:[%s3119_s3 + $0x14c] sm:$0xf] }
  0xa7   : > { %v431_v10 = vmax.f32 %v358_v5, 0.0  ;;  %v432_v11 = vmax.f32 %v405_v6, 0.0  ;;  %v2279_v5 = vld [vmem:[%s3119_s3 + $0x154] sm:$0xf0]  ;;  %1218 = vmatpush.bf16.msra.mxu0 %v2038_v2  ;;  %v2262_v2 = vld [vmem:[%s3121_s5 + $0x48] sm:$0xff] }
  0xa8   : > { %v2070_v6 = vor.u32 %v2279_v5, %v2069_v4  ;;  %v2177_v4 = vld [vmem:[%s3119_s3 + $0x1ac] sm:$0xf]  ;;  %v2306_v5 = vld [vmem:[%s3119_s3 + $0x1b8] sm:$0xf0] }
  0xa9   : > { %v2653_v12 = vpack.c.bf16 %v431_v10, %v429_v8  ;;  %v2655_v13 = vpack.c.bf16 %v432_v11, %v430_v9  ;;  %v2243_v8 = vld [vmem:[%s3121_s5 + $0x30] sm:$0xff]  ;;  %v2065_v9 = vld [vmem:[%s3119_s3 + $0x128] sm:$0xf]  ;;  %v2278_v10 = vld [vmem:[%s3119_s3 + $0x134] sm:$0xf0]  ;;  %v414_v11 = vadd.f32 %v413_v34, %v2635_v48 }
  0xaa   : > { %1252 = vmatpush.bf16.msra.mxu1 %v2070_v6  ;;  %v2066_v18 = vor.u32 %v2278_v10, %v2065_v9  ;;  %1048 = vmatpush.bf16.msra.mxu3 %v2243_v8  ;;  %v2178_v6 = vor.u32 %v2306_v5, %v2177_v4  ;;  %v2305_v8 = vld [vmem:[%s3119_s3 + $0x198] sm:$0xf0]  ;;  %v2237_v10 = vld [vmem:[%s3121_s5] sm:$0xff] }
  0xab   : > { %600 = vmatmul.bf16.gmra.mxu2 %v2653_v12  ;;  %634 = vmatmul.bf16.gmra.mxu3 %v2655_v13  ;;  %v369_v53 = vpop.f32.mrf.mxu2  ;;  %v438_v23 = vmax.f32 %v414_v11, 0.0  ;;  %v419_v25 = vpop.f32.mrf.mxu3  ;;  %v2174_v9 = vor.u32 %v2305_v8, %v2173_v3  ;;  %v2169_v11 = vld [vmem:[%s3119_s3 + $0x16c] sm:$0xf]  ;;  %v2297_v8 = vld [vmem:[%s3119_s3 + $0x98] sm:$0xf0] }
  0xac   : > { %831 = vmatmul.bf16.gmra.mxu0 %v2653_v12  ;;  %865 = vmatmul.bf16.gmra.mxu1 %v2655_v13  ;;  %v407_v19 = vpop.f32.mrf.mxu1  ;;  %v370_v15 = vadd.f32 %v369_v53, %v2633_v47  ;;  %v420_v37 = vadd.f32 %v419_v25, %v2635_v48  ;;  %v2266_v53 = vld [vmem:[%s3121_s5 + $0x68] sm:$0xff] }
  0xad   : > { %v408_v30 = vadd.f32 %v407_v19, %v2635_v48  ;;  %v2029_v19 = vld [vmem:[%s3119_s3 + $0x8] sm:$0xf]  ;;  %1219 = vmatpush.bf16.msra.mxu0 %v2034_v17  ;;  %v2781_v32 = vpack.c.bf16 %v440_v28, %v438_v23  ;;  %v2303_v17 = vld [vmem:[%s3119_s3 + $0x158] sm:$0xf0]  ;;  %v2157_v25 = vld [vmem:[%s3119_s3 + $0x10c] sm:$0xf] }
  0xae   : > { %v439_v27 = vmax.f32 %v370_v15, 0.0  ;;  %v2030_v29 = vor.u32 %v2269_v20, %v2029_v19  ;;  %1253 = vmatpush.bf16.msra.mxu1 %v2066_v18  ;;  %1049 = vmatpush.bf16.msra.mxu3 %v2242_v33  ;;  %v2170_v15 = vor.u32 %v2304_v14, %v2169_v11  ;;  %v2166_v18 = vor.u32 %v2303_v17, %v2165_v16  ;;  %v2161_v19 = vld [vmem:[%s3119_s3 + $0x12c] sm:$0xf]  ;;  %v2302_v20 = vld [vmem:[%s3119_s3 + $0x138] sm:$0xf0] }
  0xaf   : > { %v434_v42 = vmax.f32 %v408_v30, 0.0  ;;  %v2062_v30 = vor.u32 %v2277_v22, %v2061_v21  ;;  %v2153_v21 = vld [vmem:[%s3119_s3 + $0xec] sm:$0xf]  ;;  %v2300_v22 = vld [vmem:[%s3119_s3 + $0xf8] sm:$0xf0]  ;;  %v2162_v23 = vor.u32 %v2302_v20, %v2161_v19 }
  0xb0   : > { %v2779_v31 = vpack.c.bf16 %v439_v27, %v437_v26  ;;  %v2301_v26 = vld [vmem:[%s3119_s3 + $0x118] sm:$0xf0]  ;;  %v2141_v3 = vld [vmem:[%s3119_s3 + $0x8c] sm:$0xf] }
  0xb1   : > { %v2713_v51 = vpack.c.bf16 %v436_v41, %v434_v42  ;;  %1220 = vmatpush.bf16.msra.mxu0 %v2030_v29  ;;  %v442_v41 = vmax.f32 %v420_v37, 0.0  ;;  %v2158_v27 = vor.u32 %v2301_v26, %v2157_v25  ;;  %v2299_v37 = vld [vmem:[%s3119_s3 + $0xd8] sm:$0xf0] }
  0xb2   : > { %1254 = vmatpush.bf16.msra.mxu1 %v2062_v30  ;;  %v2904_v30 = vld [vmem:[%s3120_s4 + $0x1] ss:$0 sm:$0xff] }
  0xb3   : > { %v372_v24 = vpop.f32.mrf.mxu2  ;;  %v422_v35 = vpop.f32.mrf.mxu3 }
  0xb4   : > { %v373_v36 = vadd.f32 %v372_v24, %v2633_v47  ;;  %v423_v39 = vadd.f32 %v422_v35, %v2635_v48  ;;  %v2268_v48 = vld [vmem:[%s3121_s5 + $0x78] sm:$0xff]  ;;  %v2154_v24 = vor.u32 %v2300_v22, %v2153_v21 }
  0xb5   : > { %965 = vmatpush.bf16.msra.mxu2 %v2268_v48  ;;  %1570 = vmatpush.bf16.msrb.mxu0 %v2186_v58 }
  0xb6   : > { %v441_v40 = vmax.f32 %v373_v36, 0.0  ;;  %v444_v43 = vmax.f32 %v423_v39, 0.0  ;;  %v2149_v36 = vld [vmem:[%s3119_s3 + $0xcc] sm:$0xf] }
  0xb7   : > { %v2150_v39 = vor.u32 %v2299_v37, %v2149_v36 }
  0xb8   : > { %v2796_v45 = vpack.c.bf16 %v444_v43, %v442_v41 }
  0xb9   : > { %966 = vmatpush.bf16.msra.mxu2 %v2267_v49  ;;  %1571 = vmatpush.bf16.msrb.mxu0 %v2182_v1 }
  0xbb   : > { %605 = vmatmul.bf16.gmra.mxu2 %v2715_v52  ;;  %639 = vmatmul.bf16.gmra.mxu3 %v2713_v51  ;;  %v375_v34 = vpop.f32.mrf.mxu2 }
  0xbc   : > { %836 = vmatmul.bf16.gmra.mxu0 %v2715_v52  ;;  %870 = vmatmul.bf16.gmra.mxu1 %v2713_v51  ;;  %v376_v38 = vadd.f32 %v375_v34, %v2633_v47  ;;  %v2241_v47 = vld [vmem:[%s3121_s5 + $0x20] sm:$0xff] }
  0xbd   : > { %1050 = vmatpush.bf16.msra.mxu3 %v2241_v47  ;;  %967 = vmatpush.bf16.msra.mxu2 %v2266_v53 }
  0xbe   : > { %v443_v42 = vmax.f32 %v376_v38, 0.0  ;;  %1572 = vmatpush.bf16.msrb.mxu0 %v2178_v6  ;;  %v2918_v38 = vld [vmem:[%s3120_s4] ss:$0 sm:$0xff] }
  0xc0   : > { %v2794_v44 = vpack.c.bf16 %v443_v42, %v441_v40 }
  0xc1   : > { %1051 = vmatpush.bf16.msra.mxu3 %v2240_v46  ;;  %968 = vmatpush.bf16.msra.mxu2 %v2265_v54  ;;  %v2145_v54 = vld [vmem:[%s3119_s3 + $0xac] sm:$0xf] }
  0xc2   : > { %1573 = vmatpush.bf16.msrb.mxu0 %v2174_v9  ;;  %v2142_v9 = vor.u32 %v2297_v8, %v2141_v3 }
  0xc5   : > { %1052 = vmatpush.bf16.msra.mxu3 %v2239_v50  ;;  %969 = vmatpush.bf16.msra.mxu2 %v2264_v55  ;;  %v2298_v55 = vld [vmem:[%s3119_s3 + $0xb8] sm:$0xf0] }
  0xc6   : > { %1574 = vmatpush.bf16.msrb.mxu0 %v2170_v15  ;;  %v2146_v58 = vor.u32 %v2298_v55, %v2145_v54 }
  0xc9   : > { %970 = vmatpush.bf16.msra.mxu2 %v2263_v61  ;;  %1053 = vmatpush.bf16.msra.mxu3 %v2238_v62 }
  0xca   : > { %1575 = vmatpush.bf16.msrb.mxu0 %v2166_v18 }
  0xcb   : > { %610 = vmatmul.bf16.gmra.mxu2 %v2779_v31  ;;  %644 = vmatmul.bf16.gmra.mxu3 %v2781_v32 }
  0xcc   : > { %841 = vmatmul.bf16.gmra.mxu0 %v2779_v31  ;;  %875 = vmatmul.bf16.gmra.mxu1 %v2781_v32 }
  0xcd   : > { %971 = vmatpush.bf16.msra.mxu2 %v2262_v2  ;;  %1054 = vmatpush.bf16.msra.mxu3 %v2237_v10 }
  0xce   : > { %1576 = vmatpush.bf16.msrb.mxu0 %v2162_v23 }
  0xd1   : > { %972 = vmatpush.bf16.msra.mxu2 %v2261_v7  ;;  %1536 = vmatpush.bf16.msrb.mxu3 %v2154_v24 }
  0xd2   : > { %1577 = vmatpush.bf16.msrb.mxu0 %v2158_v27 }
  0xd5   : > { %1537 = vmatpush.bf16.msrb.mxu3 %v2150_v39  ;;  %v2291_v39 = vld [vmem:[%s3121_s5 + $0xb0] sm:$0xff] }
  0xd9   : > { %1538 = vmatpush.bf16.msrb.mxu3 %v2146_v58 }
  0xdb   : > { %615 = vmatmul.bf16.gmra.mxu2 %v2794_v44  ;;  %649 = vmatmul.bf16.gmra.mxu3 %v2796_v45 }
  0xdc   : > { %846 = vmatmul.bf16.gmra.mxu0 %v2794_v44  ;;  %880 = vmatmul.bf16.gmra.mxu1 %v2796_v45 }
  0xdd   : > { %1539 = vmatpush.bf16.msrb.mxu3 %v2142_v9  ;;  %v2287_v9 = vld [vmem:[%s3121_s5 + $0x90] sm:$0xff] }
  0xec   : > { %1221 = vmatmul.bf16.vlgmr.msra.gmra.mxu0 %v2641_v59  ;;  %1255 = vmatmul.bf16.vlgmr.msra.gmra.mxu1 %v2643_v60 }
  0xfc   : > { %1226 = vmatmul.bf16.gmra.mxu0 %v2653_v12  ;;  %1260 = vmatmul.bf16.gmra.mxu1 %v2655_v13 }
 0x10c   : > { %1231 = vmatmul.bf16.gmra.mxu0 %v2715_v52  ;;  %1265 = vmatmul.bf16.gmra.mxu1 %v2713_v51 }
 0x119   : > { %v827_v28 = vpop.f32.mrf.mxu0  ;;  %v861_v29 = vpop.f32.mrf.mxu1 }
 0x11a   : > { %v828_v33 = vadd.f32 %v2904_v30, %v827_v28  ;;  %v2292_v28 = vld [vmem:[%s3121_s5 + $0xb8] sm:$0xff] }
 0x11b   : > { %1360 = vmatpush.bf16.msrb.mxu2 %v2292_v28 }
 0x11c   : > { %1236 = vmatmul.bf16.gmra.mxu0 %v2779_v31  ;;  %1270 = vmatmul.bf16.gmra.mxu1 %v2781_v32  ;;  %v862_v42 = vadd.f32 %v861_v29, %v828_v33 }
 0x11e   : > { %v596_v34 = vpop.f32.mrf.mxu2  ;;  %v630_v35 = vpop.f32.mrf.mxu3  ;;  %v886_v46 = vmax.f32 %v862_v42, 0.0 }
 0x11f   : > { %v597_v47 = vadd.f32 %v2918_v38, %v596_v34  ;;  %v2137_v34 = vld [vmem:[%s3119_s3 + $0x6c] sm:$0xf]  ;;  %1361 = vmatpush.bf16.msrb.mxu2 %v2291_v39 }
 0x121   : > { %v829_v40 = vpop.f32.mrf.mxu0  ;;  %v863_v41 = vpop.f32.mrf.mxu1  ;;  %v631_v56 = vadd.f32 %v630_v35, %v597_v47  ;;  %v2296_v35 = vld [vmem:[%s3119_s3 + $0x78] sm:$0xf0] }
 0x122   : > { %v830_v43 = vadd.f32 %v2904_v30, %v829_v40  ;;  %v2138_v36 = vor.u32 %v2296_v35, %v2137_v34  ;;  %v2125_v35 = vld [vmem:[%s3119_s3 + $0xc] sm:$0xf] }
 0x123   : > { %v655_v1 = vmax.f32 %v631_v56, 0.0 }
 0x124   : > { %v864_v48 = vadd.f32 %v863_v41, %v830_v43  ;;  %1540 = vmatpush.bf16.msrb.mxu3 %v2138_v36  ;;  %v2293_v36 = vld [vmem:[%s3119_s3 + $0x18] sm:$0xf0] }
 0x126   : > { %v887_v49 = vmax.f32 %v864_v48, 0.0  ;;  %v598_v50 = vpop.f32.mrf.mxu2  ;;  %v632_v53 = vpop.f32.mrf.mxu3  ;;  %v2290_v48 = vld [vmem:[%s3121_s5 + $0xa8] sm:$0xff] }
 0x127   : > { %v599_v57 = vadd.f32 %v2918_v38, %v598_v50  ;;  %1362 = vmatpush.bf16.msrb.mxu2 %v2290_v48 }
 0x128   : > { %v896_v61 = vpack.c.bf16 %v887_v49, %v886_v46 }
 0x129   : > { %v633_v62 = vadd.f32 %v632_v53, %v599_v57  ;;  %v832_v63 = vpop.f32.mrf.mxu0  ;;  %v866_v0 = vpop.f32.mrf.mxu1  ;;  %v2289_v53 = vld [vmem:[%s3121_s5 + $0xa0] sm:$0xff] }
 0x12a   : > { %973 = vmatmul.bf16.vlgmr.msra.gmra.mxu2 %v896_v61  ;;  %v833_v5 = vadd.f32 %v2904_v30, %v832_v63  ;;  %v2133_v63 = vld [vmem:[%s3119_s3 + $0x4c] sm:$0xf] }
 0x12b   : > { %v656_v2 = vmax.f32 %v633_v62, 0.0  ;;  %1363 = vmatpush.bf16.msrb.mxu2 %v2289_v53 }
 0x12c   : > { %1241 = vmatmul.bf16.gmra.mxu0 %v2794_v44  ;;  %1275 = vmatmul.bf16.gmra.mxu1 %v2796_v45  ;;  %v867_v14 = vadd.f32 %v866_v0, %v833_v5  ;;  %v2295_v0 = vld [vmem:[%s3119_s3 + $0x58] sm:$0xf0] }
 0x12d   : > { %v665_v4 = vpack.c.bf16 %v656_v2, %v655_v1  ;;  %v2134_v5 = vor.u32 %v2295_v0, %v2133_v63 }
 0x12e   : > { %v601_v6 = vpop.f32.mrf.mxu2  ;;  %v635_v7 = vpop.f32.mrf.mxu3  ;;  %v888_v18 = vmax.f32 %v867_v14, 0.0 }
 0x12f   : > { %1055 = vmatmul.bf16.vlgmr.msra.gmra.mxu3 %v665_v4  ;;  %v602_v16 = vadd.f32 %v2918_v38, %v601_v6  ;;  %v2288_v6 = vld [vmem:[%s3121_s5 + $0x98] sm:$0xff] }
 0x130   : > { %1541 = vmatpush.bf16.msrb.mxu3 %v2134_v5  ;;  %1364 = vmatpush.bf16.msrb.mxu2 %v2288_v6  ;;  %v3007_v5 = vld [vmem:[%s3120_s4 + $0x2] ss:$0 sm:$0xff] }
 0x131   : > { %v834_v10 = vpop.f32.mrf.mxu0  ;;  %v868_v11 = vpop.f32.mrf.mxu1  ;;  %v636_v22 = vadd.f32 %v635_v7, %v602_v16  ;;  %v2294_v16 = vld [vmem:[%s3119_s3 + $0x38] sm:$0xf0] }
 0x132   : > { %v835_v15 = vadd.f32 %v2904_v30, %v834_v10 }
 0x133   : > { %v657_v29 = vmax.f32 %v636_v22, 0.0 }
 0x134   : > { %v869_v17 = vadd.f32 %v868_v11, %v835_v15  ;;  %v2129_v15 = vld [vmem:[%s3119_s3 + $0x2c] sm:$0xf]  ;;  %1365 = vmatpush.bf16.msrb.mxu2 %v2287_v9 }
 0x136   : > { %v889_v19 = vmax.f32 %v869_v17, 0.0  ;;  %v603_v20 = vpop.f32.mrf.mxu2  ;;  %v637_v21 = vpop.f32.mrf.mxu3  ;;  %v2130_v17 = vor.u32 %v2294_v16, %v2129_v15 }
 0x137   : > { %v604_v23 = vadd.f32 %v2918_v38, %v603_v20 }
 0x138   : > { %v897_v24 = vpack.c.bf16 %v889_v19, %v888_v18  ;;  %1542 = vmatpush.bf16.msrb.mxu3 %v2130_v17  ;;  %v2286_v19 = vld [vmem:[%s3121_s5 + $0x88] sm:$0xff] }
 0x139   : > { %v638_v25 = vadd.f32 %v637_v21, %v604_v23  ;;  %v837_v26 = vpop.f32.mrf.mxu0  ;;  %v871_v27 = vpop.f32.mrf.mxu1  ;;  %1366 = vmatpush.bf16.msrb.mxu2 %v2286_v19 }
 0x13a   : > { %978 = vmatmul.bf16.gmra.mxu2 %v897_v24  ;;  %v838_v40 = vadd.f32 %v2904_v30, %v837_v26  ;;  %v2285_v24 = vld [vmem:[%s3121_s5 + $0x80] sm:$0xff] }
 0x13b   : > { %v658_v33 = vmax.f32 %v638_v25, 0.0 }
 0x13c   : > { %1578 = vmatmul.bf16.vlgmr.msrb.gmra.mxu0 %v2643_v60  ;;  %v872_v60 = vadd.f32 %v871_v27, %v838_v40 }
 0x13d   : > { %v666_v37 = vpack.c.bf16 %v658_v33, %v657_v29  ;;  %1367 = vmatpush.bf16.msrb.mxu2 %v2285_v24 }
 0x13e   : > { %v606_v41 = vpop.f32.mrf.mxu2  ;;  %v640_v42 = vpop.f32.mrf.mxu3  ;;  %v890_v54 = vmax.f32 %v872_v60, 0.0 }
 0x13f   : > { %1060 = vmatmul.bf16.gmra.mxu3 %v666_v37  ;;  %v607_v49 = vadd.f32 %v2918_v38, %v606_v41  ;;  %v2126_v41 = vor.u32 %v2293_v36, %v2125_v35 }
 0x141   : > { %v839_v43 = vpop.f32.mrf.mxu0  ;;  %v873_v47 = vpop.f32.mrf.mxu1  ;;  %v641_v58 = vadd.f32 %v640_v42, %v607_v49  ;;  %1543 = vmatpush.bf16.msrb.mxu3 %v2126_v41 }
 0x142   : > { %v840_v46 = vadd.f32 %v2904_v30, %v839_v43 }
 0x143   : > { %v659_v7 = vmax.f32 %v641_v58, 0.0 }
 0x144   : > { %v874_v50 = vadd.f32 %v873_v47, %v840_v46 }
 0x146   : > { %v891_v55 = vmax.f32 %v874_v50, 0.0  ;;  %v608_v56 = vpop.f32.mrf.mxu2  ;;  %v642_v57 = vpop.f32.mrf.mxu3 }
 0x147   : > { %v609_v61 = vadd.f32 %v2918_v38, %v608_v56 }
 0x148   : > { %v898_v62 = vpack.c.bf16 %v891_v55, %v890_v54 }
 0x149   : > { %v643_v1 = vadd.f32 %v642_v57, %v609_v61  ;;  %v842_v2 = vpop.f32.mrf.mxu0  ;;  %v876_v4 = vpop.f32.mrf.mxu1 }
 0x14a   : > { %983 = vmatmul.bf16.gmra.mxu2 %v898_v62  ;;  %v843_v10 = vadd.f32 %v2904_v30, %v842_v2 }
 0x14b   : > { %v660_v3 = vmax.f32 %v643_v1, 0.0 }
 0x14c   : > { %1583 = vmatmul.bf16.gmra.mxu0 %v2655_v13  ;;  %v877_v20 = vadd.f32 %v876_v4, %v843_v10 }
 0x14d   : > { %v667_v8 = vpack.c.bf16 %v660_v3, %v659_v7 }
 0x14e   : > { %v611_v11 = vpop.f32.mrf.mxu2  ;;  %v645_v14 = vpop.f32.mrf.mxu3  ;;  %v892_v25 = vmax.f32 %v877_v20, 0.0 }
 0x14f   : > { %1065 = vmatmul.bf16.gmra.mxu3 %v667_v8  ;;  %v612_v22 = vadd.f32 %v2918_v38, %v611_v11 }
 0x151   : > { %v844_v13 = vpop.f32.mrf.mxu0  ;;  %v878_v18 = vpop.f32.mrf.mxu1  ;;  %v646_v29 = vadd.f32 %v645_v14, %v612_v22 }
 0x152   : > { %v845_v21 = vadd.f32 %v2904_v30, %v844_v13 }
 0x153   : > { %v661_v42 = vmax.f32 %v646_v29, 0.0 }
 0x154   : > { %v879_v23 = vadd.f32 %v878_v18, %v845_v21 }
 0x156   : > { %v893_v26 = vmax.f32 %v879_v23, 0.0  ;;  %v613_v27 = vpop.f32.mrf.mxu2  ;;  %v647_v28 = vpop.f32.mrf.mxu3 }
 0x157   : > { %v614_v33 = vadd.f32 %v2918_v38, %v613_v27 }
 0x158   : > { %v899_v34 = vpack.c.bf16 %v893_v26, %v892_v25 }
 0x159   : > { %v648_v37 = vadd.f32 %v647_v28, %v614_v33  ;;  %v847_v39 = vpop.f32.mrf.mxu0  ;;  %v881_v40 = vpop.f32.mrf.mxu1 }
 0x15a   : > { %988 = vmatmul.bf16.gmra.mxu2 %v899_v34  ;;  %v848_v48 = vadd.f32 %v2904_v30, %v847_v39 }
 0x15b   : > { %v662_v43 = vmax.f32 %v648_v37, 0.0 }
 0x15c   : > { %1588 = vmatmul.bf16.gmra.mxu0 %v2713_v51  ;;  %v882_v53 = vadd.f32 %v881_v40, %v848_v48  ;;  %v2316_v48 = vld [vmem:[%s3121_s5 + $0xf8] sm:$0xff] }
 0x15d   : > { %v668_v47 = vpack.c.bf16 %v662_v43, %v661_v42  ;;  %1683 = vmatpush.bf16.msrb.mxu1 %v2316_v48 }
 0x15e   : > { %v616_v60 = vpop.f32.mrf.mxu2  ;;  %v650_v46 = vpop.f32.mrf.mxu3  ;;  %v894_v57 = vmax.f32 %v882_v53, 0.0 }
 0x15f   : > { %1070 = vmatmul.bf16.gmra.mxu3 %v668_v47  ;;  %v617_v55 = vadd.f32 %v2918_v38, %v616_v60 }
 0x161   : > { %v849_v49 = vpop.f32.mrf.mxu0  ;;  %v883_v50 = vpop.f32.mrf.mxu1  ;;  %v651_v62 = vadd.f32 %v650_v46, %v617_v55 }
 0x162   : > { %v850_v54 = vadd.f32 %v2904_v30, %v849_v49 }
 0x163   : > { %v663_v30 = vmax.f32 %v651_v62, 0.0 }
 0x164   : > { %v884_v56 = vadd.f32 %v883_v50, %v850_v54 }
 0x166   : > { %v895_v58 = vmax.f32 %v884_v56, 0.0  ;;  %v618_v61 = vpop.f32.mrf.mxu2  ;;  %v652_v0 = vpop.f32.mrf.mxu3 }
 0x167   : > { %v619_v51 = vadd.f32 %v2918_v38, %v618_v61 }
 0x168   : > { %v900_v63 = vpack.c.bf16 %v895_v58, %v894_v57 }
 0x169   : > { %v653_v1 = vadd.f32 %v652_v0, %v619_v51  ;;  %v1222_v2 = vpop.f32.mrf.mxu0  ;;  %v1256_v4 = vpop.f32.mrf.mxu1 }
 0x16a   : > { %993 = vmatmul.bf16.gmra.mxu2 %v900_v63  ;;  %v1223_v3 = vadd.f32 %v3007_v5, %v1222_v2  ;;  %v2314_v2 = vld [vmem:[%s3121_s5 + $0xe8] sm:$0xff] }
 0x16b   : > { %v664_v6 = vmax.f32 %v653_v1, 0.0 }
 0x16c   : > { %1593 = vmatmul.bf16.gmra.mxu0 %v2781_v32  ;;  %v1257_v9 = vadd.f32 %v1256_v4, %v1223_v3 }
 0x16d   : > { %v669_v7 = vpack.c.bf16 %v664_v6, %v663_v30 }
 0x16e   : > { %v1281_v14 = vmax.f32 %v1257_v9, 0.0 }
 0x16f   : > { %1075 = vmatmul.bf16.gmra.mxu3 %v669_v7 }
 0x171   : > { %v1224_v38 = vpop.f32.mrf.mxu0  ;;  %v1258_v8 = vpop.f32.mrf.mxu1 }
 0x172   : > { %v1225_v10 = vadd.f32 %v3007_v5, %v1224_v38 }
 0x174   : > { %v1259_v11 = vadd.f32 %v1258_v8, %v1225_v10 }
 0x176   : > { %v1282_v15 = vmax.f32 %v1259_v11, 0.0 }
 0x178   : > { %v1291_v16 = vpack.c.bf16 %v1282_v15, %v1281_v14  ;;  %v2312_v14 = vld [vmem:[%s3121_s5 + $0xd8] sm:$0xff] }
 0x179   : > { %v1227_v17 = vpop.f32.mrf.mxu0  ;;  %v1261_v13 = vpop.f32.mrf.mxu1 }
 0x17a   : > { %1368 = vmatmul.bf16.vlgmr.msrb.gmra.mxu2 %v1291_v16  ;;  %v1228_v32 = vadd.f32 %v3007_v5, %v1227_v17 }
 0x17c   : > { %1598 = vmatmul.bf16.gmra.mxu0 %v2796_v45  ;;  %v1262_v20 = vadd.f32 %v1261_v13, %v1228_v32  ;;  %v2311_v13 = vld [vmem:[%s3121_s5 + $0xd0] sm:$0xff] }
 0x17e   : > { %v1283_v23 = vmax.f32 %v1262_v20, 0.0  ;;  %v2310_v20 = vld [vmem:[%s3121_s5 + $0xc8] sm:$0xff] }
 0x17f   : > { %1544 = vmatmul.bf16.vlgmr.msrb.gmra.mxu3 %v2641_v59 }
 0x181   : > { %v1229_v18 = vpop.f32.mrf.mxu0  ;;  %v1263_v19 = vpop.f32.mrf.mxu1 }
 0x182   : > { %v1230_v21 = vadd.f32 %v3007_v5, %v1229_v18 }
 0x184   : > { %v1264_v22 = vadd.f32 %v1263_v19, %v1230_v21 }
 0x186   : > { %v1284_v24 = vmax.f32 %v1264_v22, 0.0 }
 0x188   : > { %v1292_v25 = vpack.c.bf16 %v1284_v24, %v1283_v23  ;;  %v2309_v24 = vld [vmem:[%s3121_s5 + $0xc0] sm:$0xff] }
 0x189   : > { %v1232_v26 = vpop.f32.mrf.mxu0  ;;  %v1266_v27 = vpop.f32.mrf.mxu1 }
 0x18a   : > { %1373 = vmatmul.bf16.gmra.mxu2 %v1292_v25  ;;  %v1233_v28 = vadd.f32 %v3007_v5, %v1232_v26 }
 0x18c   : > { %v1267_v33 = vadd.f32 %v1266_v27, %v1233_v28 }
 0x18e   : > { %v1285_v35 = vmax.f32 %v1267_v33, 0.0 }
 0x18f   : > { %1549 = vmatmul.bf16.gmra.mxu3 %v2653_v12 }
 0x191   : > { %v1234_v45 = vpop.f32.mrf.mxu0  ;;  %v1268_v29 = vpop.f32.mrf.mxu1 }
 0x192   : > { %v1235_v59 = vadd.f32 %v3007_v5, %v1234_v45 }
 0x194   : > { %v1269_v34 = vadd.f32 %v1268_v29, %v1235_v59 }
 0x196   : > { %v1286_v36 = vmax.f32 %v1269_v34, 0.0 }
 0x198   : > { %v1293_v37 = vpack.c.bf16 %v1286_v36, %v1285_v35 }
 0x199   : > { %v1237_v39 = vpop.f32.mrf.mxu0  ;;  %v1271_v40 = vpop.f32.mrf.mxu1 }
 0x19a   : > { %1378 = vmatmul.bf16.gmra.mxu2 %v1293_v37  ;;  %v1238_v41 = vadd.f32 %v3007_v5, %v1237_v39  ;;  %v2330_v37 = vld [vmem:[%s3120_s4 + $0x3] ss:$0 sm:$0xff] }
 0x19c   : > { %v1272_v47 = vadd.f32 %v1271_v40, %v1238_v41 }
 0x19e   : > { %v1287_v46 = vmax.f32 %v1272_v47, 0.0 }
 0x19f   : > { %1554 = vmatmul.bf16.gmra.mxu3 %v2715_v52  ;;  %v2315_v52 = vld [vmem:[%s3121_s5 + $0xf0] sm:$0xff] }
 0x1a0   : > { %1684 = vmatpush.bf16.msrb.mxu1 %v2315_v52 }
 0x1a1   : > { %v1239_v42 = vpop.f32.mrf.mxu0  ;;  %v1273_v43 = vpop.f32.mrf.mxu1 }
 0x1a2   : > { %v1240_v12 = vadd.f32 %v3007_v5, %v1239_v42 }
 0x1a4   : > { %v1274_v60 = vadd.f32 %v1273_v43, %v1240_v12  ;;  %1685 = vmatpush.bf16.msrb.mxu1 %v2314_v2 }
 0x1a6   : > { %v1288_v49 = vmax.f32 %v1274_v60, 0.0 }
 0x1a8   : > { %v1294_v50 = vpack.c.bf16 %v1288_v49, %v1287_v46 }
 0x1a9   : > { %v1242_v53 = vpop.f32.mrf.mxu0  ;;  %v1276_v54 = vpop.f32.mrf.mxu1 }
 0x1aa   : > { %1383 = vmatmul.bf16.gmra.mxu2 %v1294_v50  ;;  %v1243_v56 = vadd.f32 %v3007_v5, %v1242_v53 }
 0x1ac   : > { %v1277_v58 = vadd.f32 %v1276_v54, %v1243_v56 }
 0x1ad   : > { %v974_v55 = vpop.f32.mrf.mxu2 }
 0x1ae   : > { %v1289_v4 = vmax.f32 %v1277_v58, 0.0 }
 0x1af   : > { %1559 = vmatmul.bf16.gmra.mxu3 %v2779_v31 }
 0x1b1   : > { %v1244_v57 = vpop.f32.mrf.mxu0  ;;  %v1278_v51 = vpop.f32.mrf.mxu1 }
 0x1b2   : > { %v1245_v61 = vadd.f32 %v3007_v5, %v1244_v57  ;;  %v1056_v62 = vpop.f32.mrf.mxu3  ;;  %v2313_v5 = vld [vmem:[%s3121_s5 + $0xe0] sm:$0xff] }
 0x1b3   : > { %v3031_v63 = vadd.f32 %v1056_v62, %v974_v55  ;;  %1686 = vmatpush.bf16.msrb.mxu1 %v2313_v5 }
 0x1b4   : > { %v1279_v0 = vadd.f32 %v1278_v51, %v1245_v61 }
 0x1b5   : > { %v976_v1 = vpop.f32.mrf.mxu2 }
 0x1b6   : > { %v1290_v30 = vmax.f32 %v1279_v0, 0.0 }
 0x1b7   : > { %1687 = vmatpush.bf16.msrb.mxu1 %v2312_v14 }
 0x1b8   : > { %v1295_v6 = vpack.c.bf16 %v1290_v30, %v1289_v4 }
 0x1b9   : > { %v1579_v28 = vpop.f32.mrf.mxu0 }
 0x1ba   : > { %1388 = vmatmul.bf16.gmra.mxu2 %v1295_v6  ;;  %v1058_v31 = vpop.f32.mrf.mxu3 }
 0x1bb   : > { %v3036_v7 = vadd.f32 %v1058_v31, %v976_v1  ;;  %1688 = vmatpush.bf16.msrb.mxu1 %v2311_v13 }
 0x1bd   : > { %v979_v3 = vpop.f32.mrf.mxu2 }
 0x1bf   : > { %1564 = vmatmul.bf16.gmra.mxu3 %v2794_v44  ;;  %1689 = vmatpush.bf16.msrb.mxu1 %v2310_v20 }
 0x1c1   : > { %v1581_v35 = vpop.f32.mrf.mxu0 }
 0x1c2   : > { %v1061_v38 = vpop.f32.mrf.mxu3 }
 0x1c3   : > { %v3042_v8 = vadd.f32 %v1061_v38, %v979_v3  ;;  %1690 = vmatpush.bf16.msrb.mxu1 %v2309_v24 }
 0x1c5   : > { %v981_v9 = vpop.f32.mrf.mxu2 }
 0x1c9   : > { %v1584_v39 = vpop.f32.mrf.mxu0 }
 0x1ca   : > { %v1063_v10 = vpop.f32.mrf.mxu3 }
 0x1cb   : > { %v3044_v11 = vadd.f32 %v1063_v10, %v981_v9 }
 0x1cd   : > { %v984_v15 = vpop.f32.mrf.mxu2 }
 0x1d1   : > { %v1586_v60 = vpop.f32.mrf.mxu0 }
 0x1d2   : > { %v1066_v16 = vpop.f32.mrf.mxu3 }
 0x1d3   : > { %v3049_v44 = vadd.f32 %v1066_v16, %v984_v15 }
 0x1d5   : > { %v986_v17 = vpop.f32.mrf.mxu2 }
 0x1d9   : > { %v1589_v53 = vpop.f32.mrf.mxu0 }
 0x1da   : > { %v1068_v32 = vpop.f32.mrf.mxu3 }
 0x1db   : > { %v3054_v18 = vadd.f32 %v1068_v32, %v986_v17 }
 0x1dd   : > { %v989_v19 = vpop.f32.mrf.mxu2 }
 0x1e1   : > { %v1591_v51 = vpop.f32.mrf.mxu0 }
 0x1e2   : > { %v1071_v21 = vpop.f32.mrf.mxu3 }
 0x1e3   : > { %v3059_v22 = vadd.f32 %v1071_v21, %v989_v19 }
 0x1e5   : > { %v991_v23 = vpop.f32.mrf.mxu2 }
 0x1e9   : > { %v1594_v6 = vpop.f32.mrf.mxu0 }
 0x1ea   : > { %v1073_v25 = vpop.f32.mrf.mxu3 }
 0x1eb   : > { %v3064_v26 = vadd.f32 %v1073_v25, %v991_v23 }
 0x1ed   : > { %v994_v27 = vpop.f32.mrf.mxu2 }
 0x1f1   : > { %v1596_v10 = vpop.f32.mrf.mxu0 }
 0x1f2   : > { %v1076_v45 = vpop.f32.mrf.mxu3 }
 0x1f3   : > { %v3066_v29 = vadd.f32 %v1076_v45, %v994_v27 }
 0x1f5   : > { %v996_v33 = vpop.f32.mrf.mxu2 }
 0x1f9   : > { %v1599_v20 = vpop.f32.mrf.mxu0 }
 0x1fa   : > { %v1078_v59 = vpop.f32.mrf.mxu3 }
 0x1fb   : > { %v3068_v34 = vadd.f32 %v1078_v59, %v996_v33 }
 0x202   : > { %v1545_v36 = vpop.f32.mrf.mxu3 }
 0x203   : > { %v1546_v40 = vadd.f32 %v2330_v37, %v1545_v36  ;;  %v1369_v36 = vpop.f32.mrf.mxu2 }
 0x205   : > { %v1580_v42 = vadd.f32 %v1579_v28, %v1546_v40  ;;  %v1601_v28 = vpop.f32.mrf.mxu0 }
 0x207   : > { %v1604_v12 = vmax.f32 %v1580_v42, 0.0  ;;  %v2331_v42 = vld [vmem:[%s3122_s6] ss:$0 sm:$0xff] }
 0x20a   : > { %v1547_v41 = vpop.f32.mrf.mxu3 }
 0x20b   : > { %v1548_v43 = vadd.f32 %v2330_v37, %v1547_v41  ;;  %v1394_v41 = vadd.f32 %v1369_v36, %v3031_v63 }
 0x20d   : > { %v1582_v47 = vadd.f32 %v1581_v35, %v1548_v43 }
 0x20f   : > { %v1605_v48 = vmax.f32 %v1582_v47, 0.0 }
 0x211   : > { %v1614_v46 = vpack.c.bf16 %v1605_v48, %v1604_v12 }
 0x212   : > { %v1550_v49 = vpop.f32.mrf.mxu3 }
 0x213   : > { %1691 = vmatmul.bf16.vlgmr.msrb.gmra.mxu1 %v1614_v46  ;;  %v1551_v50 = vadd.f32 %v2330_v37, %v1550_v49 }
 0x215   : > { %v1585_v55 = vadd.f32 %v1584_v39, %v1551_v50  ;;  %v1371_v39 = vpop.f32.mrf.mxu2 }
 0x216   : > { %v1395_v63 = vadd.f32 %v1371_v39, %v3036_v7 }
 0x217   : > { %v1606_v57 = vmax.f32 %v1585_v55, 0.0 }
 0x21a   : > { %v1552_v54 = vpop.f32.mrf.mxu3 }
 0x21b   : > { %v1553_v52 = vadd.f32 %v2330_v37, %v1552_v54 }
 0x21d   : > { %v1587_v56 = vadd.f32 %v1586_v60, %v1553_v52  ;;  %v1374_v40 = vpop.f32.mrf.mxu2 }
 0x21e   : > { %v1396_v49 = vadd.f32 %v1374_v40, %v3042_v8 }
 0x21f   : > { %v1607_v58 = vmax.f32 %v1587_v56, 0.0 }
 0x221   : > { %v1615_v61 = vpack.c.bf16 %v1607_v58, %v1606_v57 }
 0x222   : > { %v1555_v62 = vpop.f32.mrf.mxu3 }
 0x223   : > { %1696 = vmatmul.bf16.gmra.mxu1 %v1615_v61  ;;  %v1556_v0 = vadd.f32 %v2330_v37, %v1555_v62 }
 0x225   : > { %v1590_v2 = vadd.f32 %v1589_v53, %v1556_v0  ;;  %v1376_v12 = vpop.f32.mrf.mxu2 }
 0x226   : > { %v1397_v52 = vadd.f32 %v1376_v12, %v3044_v11 }
 0x227   : > { %v1608_v31 = vmax.f32 %v1590_v2, 0.0 }
 0x22a   : > { %v1557_v1 = vpop.f32.mrf.mxu3 }
 0x22b   : > { %v1558_v4 = vadd.f32 %v2330_v37, %v1557_v1 }
 0x22d   : > { %v1592_v30 = vadd.f32 %v1591_v51, %v1558_v4  ;;  %v1379_v54 = vpop.f32.mrf.mxu2 }
 0x22e   : > { %v1398_v61 = vadd.f32 %v1379_v54, %v3049_v44 }
 0x22f   : > { %v1609_v3 = vmax.f32 %v1592_v30, 0.0 }
 0x231   : > { %v1616_v5 = vpack.c.bf16 %v1609_v3, %v1608_v31 }
 0x232   : > { %v1560_v38 = vpop.f32.mrf.mxu3 }
 0x233   : > { %1701 = vmatmul.bf16.gmra.mxu1 %v1616_v5  ;;  %v1561_v9 = vadd.f32 %v2330_v37, %v1560_v38 }
 0x235   : > { %v1595_v15 = vadd.f32 %v1594_v6, %v1561_v9  ;;  %v1381_v58 = vpop.f32.mrf.mxu2 }
 0x236   : > { %v1399_v1 = vadd.f32 %v1381_v58, %v3054_v18 }
 0x237   : > { %v1610_v13 = vmax.f32 %v1595_v15, 0.0 }
 0x23a   : > { %v1562_v14 = vpop.f32.mrf.mxu3 }
 0x23b   : > { %v1563_v16 = vadd.f32 %v2330_v37, %v1562_v14 }
 0x23d   : > { %v1597_v17 = vadd.f32 %v1596_v10, %v1563_v16  ;;  %v1384_v0 = vpop.f32.mrf.mxu2 }
 0x23e   : > { %v1400_v30 = vadd.f32 %v1384_v0, %v3059_v22 }
 0x23f   : > { %v1611_v32 = vmax.f32 %v1597_v17, 0.0 }
 0x241   : > { %v1617_v19 = vpack.c.bf16 %v1611_v32, %v1610_v13 }
 0x242   : > { %v1565_v21 = vpop.f32.mrf.mxu3 }
 0x243   : > { %1706 = vmatmul.bf16.gmra.mxu1 %v1617_v19  ;;  %v1566_v23 = vadd.f32 %v2330_v37, %v1565_v21 }
 0x245   : > { %v1600_v25 = vadd.f32 %v1599_v20, %v1566_v23  ;;  %v1386_v6 = vpop.f32.mrf.mxu2 }
 0x246   : > { %v1401_v5 = vadd.f32 %v1386_v6, %v3064_v26 }
 0x247   : > { %v1612_v33 = vmax.f32 %v1600_v25, 0.0 }
 0x24a   : > { %v1567_v24 = vpop.f32.mrf.mxu3 }
 0x24b   : > { %v1568_v27 = vadd.f32 %v2330_v37, %v1567_v24 }
 0x24d   : > { %v1602_v45 = vadd.f32 %v1601_v28, %v1568_v27  ;;  %v1389_v9 = vpop.f32.mrf.mxu2 }
 0x24e   : > { %v1402_v14 = vadd.f32 %v1389_v9, %v3066_v29 }
 0x24f   : > { %v1613_v59 = vmax.f32 %v1602_v45, 0.0 }
 0x251   : > { %v1618_v35 = vpack.c.bf16 %v1613_v59, %v1612_v33 }
 0x253   : > { %1711 = vmatmul.bf16.gmra.mxu1 %v1618_v35 }
 0x255   : > { %v1391_v17 = vpop.f32.mrf.mxu2 }
 0x256   : > { %v1403_v13 = vadd.f32 %v1391_v17, %v3068_v34 }
 0x290   : > { %v1692_v43 = vpop.f32.mrf.mxu1 }
 0x291   : > { %v1717_v47 = vadd.f32 %v1692_v43, %v1394_v41 }
 0x293   : > { %v1731_v37 = vadd.f32 %v2331_v42, %v1717_v47 }
 0x295   : > { %1742 = vst.msk [vmem:[%s3082_s9] sm:$0xff] %vm1741_vm1, %v1731_v37 }
 0x298   : > { %v1694_v48 = vpop.f32.mrf.mxu1 }
 0x299   : > { %v1718_v60 = vadd.f32 %v1694_v48, %v1395_v63 }
 0x29b   : > { %v1732_v46 = vadd.f32 %v2331_v42, %v1718_v60 }
 0x29d   : > { %1743 = vst.msk [vmem:[%s3082_s9 + $0x8] sm:$0xff] %vm1741_vm1, %v1732_v46 }
 0x2a0   : > { %v1697_v50 = vpop.f32.mrf.mxu1 }
 0x2a1   : > { %v1719_v53 = vadd.f32 %v1697_v50, %v1396_v49 }
 0x2a3   : > { %v1733_v55 = vadd.f32 %v2331_v42, %v1719_v53 }
 0x2a5   : > { %1744 = vst.msk [vmem:[%s3082_s9 + $0x10] sm:$0xff] %vm1741_vm1, %v1733_v55 }
 0x2a8   : > { %v1699_v7 = vpop.f32.mrf.mxu1 }
 0x2a9   : > { %v1720_v56 = vadd.f32 %v1699_v7, %v1397_v52 }
 0x2ab   : > { %v1734_v57 = vadd.f32 %v2331_v42, %v1720_v56 }
 0x2ad   : > { %1745 = vst.msk [vmem:[%s3082_s9 + $0x18] sm:$0xff] %vm1741_vm1, %v1734_v57 }
 0x2b0   : > { %v1702_v8 = vpop.f32.mrf.mxu1 }
 0x2b1   : > { %v1721_v62 = vadd.f32 %v1702_v8, %v1398_v61 }
 0x2b3   : > { %v1735_v51 = vadd.f32 %v2331_v42, %v1721_v62 }
 0x2b5   : > { %1746 = vst.msk [vmem:[%s3082_s9 + $0x20] sm:$0xff] %vm1741_vm1, %v1735_v51 }
 0x2b8   : > { %v1704_v11 = vpop.f32.mrf.mxu1 }
 0x2b9   : > { %v1722_v2 = vadd.f32 %v1704_v11, %v1399_v1 }
 0x2bb   : > { %v1736_v4 = vadd.f32 %v2331_v42, %v1722_v2 }
 0x2bd   : > { %1747 = vst.msk [vmem:[%s3082_s9 + $0x28] sm:$0xff] %vm1741_vm1, %v1736_v4 }
 0x2c0   : > { %v1707_v44 = vpop.f32.mrf.mxu1 }
 0x2c1   : > { %v1723_v31 = vadd.f32 %v1707_v44, %v1400_v30 }
 0x2c3   : > { %v1737_v3 = vadd.f32 %v2331_v42, %v1723_v31 }
 0x2c5   : > { %1748 = vst.msk [vmem:[%s3082_s9 + $0x30] sm:$0xff] %vm1741_vm1, %v1737_v3 }
 0x2c8   : > { %v1709_v38 = vpop.f32.mrf.mxu1 }
 0x2c9   : > { %v1724_v18 = vadd.f32 %v1709_v38, %v1401_v5 }
 0x2cb   : > { %v1738_v10 = vadd.f32 %v2331_v42, %v1724_v18 }
 0x2cd   : > { %1749 = vst.msk [vmem:[%s3082_s9 + $0x38] sm:$0xff] %vm1741_vm1, %v1738_v10 }
 0x2d0   : > { %v1712_v15 = vpop.f32.mrf.mxu1 }
 0x2d1   : > { %v1725_v22 = vadd.f32 %v1712_v15, %v1402_v14 }
 0x2d3   : > { %v1739_v16 = vadd.f32 %v2331_v42, %v1725_v22 }
 0x2d5   : > { %1750 = vst.msk [vmem:[%s3082_s9 + $0x40] sm:$0xff] %vm1741_vm1, %v1739_v16 }
 0x2d8   : > { %v1714_v32 = vpop.f32.mrf.mxu1 }
 0x2d9   : > { %v1726_v19 = vadd.f32 %v1714_v32, %v1403_v13 }
 0x2db   : > { %v1740_v26 = vadd.f32 %v2331_v42, %v1726_v19 }
 0x2dd   : > { %1751 = vst.msk [vmem:[%s3082_s9 + $0x48] sm:$0xff] %vm1741_vm1, %v1740_v26 }
 0x2de PF: > { %s17_s24 = sadd.s32 1, %s2338_s24  }
 0x2df   : > { %p14_p4 = scmp.ge.s32.totalorder %s17_s24, 4  }
 0x2e1   :  { %16 = sbr.rel (!%p14_p4) target bundleno = 1 (0x1), region = 78 }

</bundles_post_ra>
